<compile_context>
chip_gen: v5e
topology: v5e:2x2
jax: 0.10.0
libtpu: 0.0.40
codegen_flags: <defaults>
</compile_context>

<pallas_src>
import functools

import jax
import jax.numpy as jnp
from jax.experimental import pallas as pl
from jax.experimental.pallas import tpu as pltpu


_VMEM_LIMIT = 32 * 1024 * 1024     # scoped-VMEM budget, safe on v5e / v6e / v7x
_NEG_INF = -1e30                   # finite "minus infinity" for padded class columns


def _round_up(x, m):
    return ((x + m - 1) // m) * m


# --------------------------------------------------------------------------- model
# TODO(synk): ISDALoss.forward takes an arbitrary backbone `model`; a synthetic
# global-average-pool + linear stand-in producing (N, feature_num) is used here.
def _feature_kernel(x_ref, w_ref, b_ref, o_ref):
    gap = jnp.mean(x_ref[...], axis=-1)                        # (tn, Cin)
    o_ref[...] = jax.lax.dot_general(                          # gap @ W^T
        gap, w_ref[...], dimension_numbers=(((1,), (1,)), ((), ())),
        preferred_element_type=jnp.float32) + b_ref[...]


def _pick_batch_tile(n, row_bytes, budget=16 * 1024 * 1024):
    # budget covers BOTH pipeline buffers of the x block (2x double-buffering).
    for cand in (1024, 512, 256, 128, 64, 32, 16, 8):
        if n % cand == 0 and 2 * cand * row_bytes <= budget:
            return cand
    return n


def model_forward(x, w_m, b_m):
    N, Cin, H, W = x.shape
    A = w_m.shape[0]
    HW = H * W
    x3 = x.reshape(N, Cin, HW)
    tn = _pick_batch_tile(N, Cin * HW * 4)
    # TODO(synk): when Cin is not a multiple of 8, a 2-D (tn*Cin, HW) presentation of
    # the GAP block would avoid sublane padding; kept 3-D here for lowering robustness.
    return pl.pallas_call(
        _feature_kernel,
        out_shape=jax.ShapeDtypeStruct((N, A), jnp.float32),
        grid=(N // tn,),
        in_specs=[
            pl.BlockSpec((tn, Cin, HW), lambda i: (i, 0, 0)),  # batch tile
            pl.BlockSpec((A, Cin), lambda i: (0, 0)),          # weight, resident
            pl.BlockSpec((1, A), lambda i: (0, 0)),            # bias, resident
        ],
        out_specs=pl.BlockSpec((tn, A), lambda i: (i, 0)),
        compiler_params=pltpu.CompilerParams(
            dimension_semantics=("parallel",),
            vmem_limit_bytes=_VMEM_LIMIT),
    )(x3, w_m, b_m.reshape(1, A))


# -------------------------------------- EstimatorCV.update_CV + per-class quad table
def _update_cov_kernel(feat_ref, lbl_ref, ave_ref, amt_ref, cov_ref, w_ref,
                       ncov_ref, nave_ref, namt_ref, dtab_ref, *, tc):
    base = pl.program_id(0) * tc
    f = feat_ref[...]                                          # (N, A) f32   (hoisted)
    lbl = lbl_ref[...]                                         # (N, 1) i32   (hoisted)
    w = w_ref[...]                                             # (C_pad, A)   (hoisted)
    for t in range(tc):                                        # tc classes per grid step
        c = base + t
        mask = (lbl == c).astype(jnp.float32)                  # (N, 1) onehot column c
        cnt = jnp.sum(mask, axis=0, keepdims=True)             # (1, 1) sum_weight[c]
        amt = jnp.maximum(cnt, 1.0)                            # (1, 1) Amount_CxA[c]
        ave_c = jnp.sum(f * mask, axis=0, keepdims=True) / amt  # (1, A) ave_CxA[c]
        xc = (f - ave_c) * mask                                # (N, A) masked + centered
        # Xc^T Xc == Xc^T F (masked, centered rows sum to zero), so only one matmul
        # operand is masked; f32 MXU operands + f32 accumulation (accuracy concern).
        var_c = jax.lax.dot_general(
            xc, f, dimension_numbers=(((0,), (0,)), ((), ())),
            preferred_element_type=jnp.float32) / amt          # (A, A)
        amt_old = amt_ref[t]                                   # (1, 1) old Amount[c]
        denom = cnt + amt_old
        wgt = jnp.where(denom > 0.0, cnt / jnp.where(denom > 0.0, denom, 1.0), 0.0)
        ave_old = ave_ref[t]                                   # (1, A) old Ave[c]
        diff = ave_old - ave_c                                 # (1, A)
        outer = jax.lax.dot_general(                           # diff^T diff -> (A, A)
            diff, diff, dimension_numbers=(((0,), (0,)), ((), ())),
            preferred_element_type=jnp.float32)
        new_cov_c = (cov_ref[t] * (1.0 - wgt) + var_c * wgt
                     + (wgt * (1.0 - wgt)) * outer)            # (A, A)
        ncov_ref[t] = new_cov_c
        nave_ref[t] = ave_old * (1.0 - wgt) + ave_c * wgt      # (1, A)
        namt_ref[t] = amt_old + cnt                            # (1, 1)
        # Per-class quadratic-form table row (replaces the per-sample cov gather):
        #   dtab[c, j] = (W_j - W_c) Cov_c (W_j - W_c)^T  for every (padded) class j.
        d = w - w_ref[pl.ds(c, 1), :]                          # (C_pad, A)
        tmat = jnp.dot(d, new_cov_c, preferred_element_type=jnp.float32)  # (C_pad, A)
        dtab_ref[t] = jnp.sum(tmat * d, axis=-1, keepdims=True)           # (C_pad, 1)


def _pick_class_tile(C, A, budget=16 * 1024 * 1024):
    # The (tc, A, A) cov block shows up 4x in VMEM (input + output, double-buffered).
    for tc in (8, 4, 2):
        if C % tc == 0 and 4 * tc * A * A * 4 <= budget:
            return tc
    return 1


def update_cv_and_quad_table(features, labels, state, w_fc_pad, class_num):
    """Functional EstimatorCV.update_CV fused with the per-class quadratic table."""
    N, A = features.shape
    C = class_num
    C_pad = w_fc_pad.shape[0]
    tc = _pick_class_tile(C, A)
    lbl2d = labels.astype(jnp.int32).reshape(N, 1)
    ave3 = state["Ave"].astype(jnp.float32).reshape(C, 1, A)
    amt3 = state["Amount"].astype(jnp.float32).reshape(C, 1, 1)
    kernel = functools.partial(_update_cov_kernel, tc=tc)
    new_cov, new_ave, new_amt, dtab = pl.pallas_call(
        kernel,
        out_shape=(
            jax.ShapeDtypeStruct((C, A, A), jnp.float32),
            jax.ShapeDtypeStruct((C, 1, A), jnp.float32),
            jax.ShapeDtypeStruct((C, 1, 1), jnp.float32),
            jax.ShapeDtypeStruct((C, C_pad, 1), jnp.float32),
        ),
        grid=(C // tc,),
        in_specs=[
            pl.BlockSpec((N, A), lambda i: (0, 0)),            # features, resident
            pl.BlockSpec((N, 1), lambda i: (0, 0)),            # labels, resident
            pl.BlockSpec((tc, 1, A), lambda i: (i, 0, 0)),     # old Ave block
            pl.BlockSpec((tc, 1, 1), lambda i: (i, 0, 0)),     # old Amount block
            pl.BlockSpec((tc, A, A), lambda i: (i, 0, 0)),     # old CoVariance block
            pl.BlockSpec((C_pad, A), lambda i: (0, 0)),        # padded fc weight, resident
        ],
        out_specs=(
            pl.BlockSpec((tc, A, A), lambda i: (i, 0, 0)),
            pl.BlockSpec((tc, 1, A), lambda i: (i, 0, 0)),
            pl.BlockSpec((tc, 1, 1), lambda i: (i, 0, 0)),
            pl.BlockSpec((tc, C_pad, 1), lambda i: (i, 0, 0)),
        ),
        compiler_params=pltpu.CompilerParams(
            dimension_semantics=("parallel",),
            vmem_limit_bytes=_VMEM_LIMIT),
    )(features, lbl2d, ave3, amt3, state["CoVariance"], w_fc_pad)
    new_state = {"CoVariance": new_cov,
                 "Ave": new_ave.reshape(C, A),
                 "Amount": new_amt.reshape(C)}
    return new_state, dtab.reshape(C, C_pad)


# ------------------------------------ fc + isda_aug + CrossEntropy (fused, batched)
def _fused_loss_kernel(feat_ref, lbl_ref, w_ref, brow_ref, dtab_ref, ratio_ref,
                       y_ref, ce_ref):
    # fc(features) for this batch tile: lane-dense (TN, C_pad), bf16 MXU, f32 acc.
    logits = jax.lax.dot_general(
        feat_ref[...].astype(jnp.bfloat16), w_ref[...].astype(jnp.bfloat16),
        dimension_numbers=(((1,), (1,)), ((), ())),
        preferred_element_type=jnp.float32) + brow_ref[...]
    y_ref[...] = logits
    # Gather dtab[label[n], :] for the whole tile with a one-hot matmul (f32, exact).
    lbl = lbl_ref[...]                                         # (TN, 1) i32
    cls = jax.lax.broadcasted_iota(jnp.int32, logits.shape, 1)
    onehot = (cls == lbl).astype(jnp.float32)                  # (TN, C_pad)
    quad = jax.lax.dot_general(
        onehot, dtab_ref[...],
        dimension_numbers=(((1,), (0,)), ((), ())),
        preferred_element_type=jnp.float32)                    # (TN, C_pad)
    aug = logits + (0.5 * ratio_ref[...]) * quad               # padded cols stay ~ -1e30
    # Row-oriented (lane-dense) softmax cross entropy; per-sample CE written out.
    m = jnp.max(aug, axis=-1, keepdims=True)                   # (TN, 1)
    lse = m + jnp.log(jnp.sum(jnp.exp(aug - m), axis=-1, keepdims=True))
    tgt = jnp.sum(onehot * aug, axis=-1, keepdims=True)
    ce_ref[...] = lse - tgt


def _pick_sample_tile(n, a, c_pad, budget=8 * 1024 * 1024):
    # budget covers the double-buffered per-tile blocks (features, labels, y, ce).
    for cand in (512, 256, 128, 64, 32, 16, 8):
        if n % cand == 0 and 2 * cand * (a + c_pad + 2) * 4 <= budget:
            return cand
    return n


def fused_logits_and_loss(features, w_fc_pad, b_row_pad, dtab_pad, labels, ratio,
                          class_num):
    N, A = features.shape
    C_pad = w_fc_pad.shape[0]
    tn = _pick_sample_tile(N, A, C_pad)
    lbl2d = labels.astype(jnp.int32).reshape(N, 1)
    ratio2d = jnp.asarray(ratio, jnp.float32).reshape(1, 1)
    y_pad, ce = pl.pallas_call(
        _fused_loss_kernel,
        out_shape=(jax.ShapeDtypeStruct((N, C_pad), jnp.float32),
                   jax.ShapeDtypeStruct((N, 1), jnp.float32)),
        grid=(N // tn,),
        in_specs=[
            pl.BlockSpec((tn, A), lambda i: (i, 0)),           # features tile
            pl.BlockSpec((tn, 1), lambda i: (i, 0)),           # labels tile
            pl.BlockSpec((C_pad, A), lambda i: (0, 0)),        # fc weight, resident
            pl.BlockSpec((1, C_pad), lambda i: (0, 0)),        # fc bias row (pad = -1e30)
            pl.BlockSpec((C_pad, C_pad), lambda i: (0, 0)),    # quad table, resident
            pl.BlockSpec((1, 1), lambda i: (0, 0)),            # ratio
        ],
        out_specs=(pl.BlockSpec((tn, C_pad), lambda i: (i, 0)),
                   pl.BlockSpec((tn, 1), lambda i: (i, 0))),
        compiler_params=pltpu.CompilerParams(
            dimension_semantics=("parallel",),
            vmem_limit_bytes=_VMEM_LIMIT),
    )(features, lbl2d, w_fc_pad, b_row_pad, dtab_pad, ratio2d)
    y = y_pad[:, :class_num]
    loss = jnp.mean(ce)
    return y, loss


# ----------------------------------------------------------------- ISDALoss.forward
def isda_loss_forward(params, state, x, target, ratio, *, class_num):
    C = class_num
    C_pad = _round_up(max(C, 128), 128)
    # Pad the fc weight/bias once: padded classes get zero weight rows and a large
    # negative bias so the lane-dense softmax over C_pad columns ignores them.
    w_fc_pad = jnp.pad(params["w_fc"].astype(jnp.float32), ((0, C_pad - C), (0, 0)))
    b_row_pad = jnp.concatenate(
        [params["b_fc"].astype(jnp.float32),
         jnp.full((C_pad - C,), _NEG_INF, jnp.float32)]).reshape(1, C_pad)

    features = model_forward(x, params["w_m"], params["b_m"])             # model(x)
    new_state, dtab = update_cv_and_quad_table(
        jax.lax.stop_gradient(features), target, state, w_fc_pad, C)
    dtab_pad = jnp.pad(dtab, ((0, C_pad - C), (0, 0)))   # padded rows never selected
    y, loss = fused_logits_and_loss(
        features, w_fc_pad, b_row_pad, dtab_pad, target, ratio, C)
    return loss, y, new_state


# ----------------------------------------------------------- reference (pure JAX, f32)
def reference_forward(params, x, target, ratio, class_num):
    hp = jax.lax.Precision.HIGHEST
    N, Cin = x.shape[0], x.shape[1]
    gap = jnp.mean(x.reshape(N, Cin, -1), axis=-1)
    features = jnp.dot(gap, params["w_m"].T, precision=hp) + params["b_m"]
    y = jnp.dot(features, params["w_fc"].T, precision=hp) + params["b_fc"]
    C = class_num
    onehot = jax.nn.one_hot(target, C, dtype=jnp.float32)
    counts = onehot.sum(0)
    amount_cxa = jnp.where(counts == 0, 1.0, counts)
    ave = jnp.dot(onehot.T, features, precision=hp) / amount_cxa[:, None]
    Xc = onehot.T[:, :, None] * (features[None] - ave[:, None, :])
    var_temp = jnp.einsum("cna,cnb->cab", Xc, Xc, precision=hp) / amount_cxa[:, None, None]
    w = jnp.where(counts > 0, 1.0, 0.0)                  # zero initial Amount -> {0,1}
    cov = var_temp * w[:, None, None]
    Wfc = params["w_fc"]
    D = Wfc[None] - Wfc[target][:, None, :]
    CVt = cov[target]
    sigma2 = ratio * jnp.einsum("nca,nab,ncb->nc", D, CVt, D, precision=hp)
    aug = y + 0.5 * sigma2
    lse = jax.nn.logsumexp(aug, axis=-1)
    loss = jnp.mean(lse - aug[jnp.arange(N), target])
    return loss, y, cov


if __name__ == "__main__":
    # small shapes: batch=8, in-channels=4, spatial=16x16, feature_num=32, class_num=10
    N, Cin, H, W = 8, 4, 16, 16
    A, C = 32, 10
    ratio = 0.5

    key = jax.random.PRNGKey(0)
    kx, kt, k1, k2, k3, k4 = jax.random.split(key, 6)
    x = jax.random.normal(kx, (N, Cin, H, W), dtype=jnp.float32)
    target = jax.random.randint(kt, (N,), 0, C, dtype=jnp.int32)

    params = {
        "w_m": 0.1 * jax.random.normal(k1, (A, Cin), dtype=jnp.float32),
        "b_m": 0.1 * jax.random.normal(k2, (A,), dtype=jnp.float32),
        "w_fc": 0.1 * jax.random.normal(k3, (C, A), dtype=jnp.float32),
        "b_fc": 0.1 * jax.random.normal(k4, (C,), dtype=jnp.float32),
    }
    # EstimatorCV initial state (zeros, like __init__)
    state = {
        "CoVariance": jnp.zeros((C, A, A), jnp.float32),
        "Ave": jnp.zeros((C, A), jnp.float32),
        "Amount": jnp.zeros((C,), jnp.float32),
    }

    fwd = jax.jit(functools.partial(isda_loss_forward, class_num=C))
    loss, y, new_state = fwd(params, state, x, target, jnp.float32(ratio))
    jax.block_until_ready((loss, y, new_state))

    loss_ref, y_ref, cov_ref = reference_forward(params, x, target, ratio, C)
    assert bool(jnp.isfinite(loss)), "loss is not finite"
    assert jnp.allclose(loss, loss_ref, atol=1e-2, rtol=1e-2), (loss, loss_ref)
    assert jnp.allclose(y, y_ref, atol=1e-2, rtol=1e-2)
    assert jnp.allclose(new_state["CoVariance"], cov_ref, atol=1e-4, rtol=1e-2)

    print("KERNEL_OK")
</pallas_src>

<mosaic_0001>
module attributes {stable_mosaic.version = 11 : i64} {
  func.func @_feature_kernel(%arg0: i32, %arg1: memref<8x4x256xf32, #tpu.memory_space<vmem>>, %arg2: memref<32x4xf32, #tpu.memory_space<vmem>>, %arg3: memref<1x32xf32, #tpu.memory_space<vmem>>, %arg4: memref<8x32xf32, #tpu.memory_space<vmem>>) attributes {dimension_semantics = [#tpu.dimension_semantics<parallel>], iteration_bounds = array<i64: 1>, scalar_prefetch = 0 : i64, scratch_operands = 0 : i64, tpu.core_type = #tpu.core_type<tc>, window_params = [{transform_indices = @transform_0, window_bounds = array<i64: 8, 4, 256>}, {pipeline_mode = #tpu.pipeline_mode<synchronous>, transform_indices = @transform_1, window_bounds = array<i64: 32, 4>}, {pipeline_mode = #tpu.pipeline_mode<synchronous>, transform_indices = @transform_2, window_bounds = array<i64: 1, 32>}, {transform_indices = @transform_3, window_bounds = array<i64: 8, 32>}]} {
    %c0 = arith.constant 0 : index
    %c0_0 = arith.constant 0 : index
    %c0_1 = arith.constant 0 : index
    %0 = vector.load %arg1[%c0, %c0_0, %c0_1] : memref<8x4x256xf32, #tpu.memory_space<vmem>>, vector<8x4x256xf32>
    %cst = arith.constant dense<0.000000e+00> : vector<8x4xf32>
    %1 = vector.multi_reduction <add>, %0, %cst [2] : vector<8x4x256xf32> to vector<8x4xf32>
    %cst_2 = arith.constant 2.560000e+02 : f32
    %2 = vector.broadcast %cst_2 : f32 to vector<8x4xf32>
    %3 = arith.divf %1, %2 : vector<8x4xf32>
    %c0_3 = arith.constant 0 : index
    %c0_4 = arith.constant 0 : index
    %4 = vector.load %arg2[%c0_3, %c0_4] : memref<32x4xf32, #tpu.memory_space<vmem>>, vector<32x4xf32>
    %cst_5 = arith.constant dense<0.000000e+00> : vector<8x32xf32>
    %5 = tpu.matmul %3, %4, %cst_5 {dimension_numbers = #tpu.dot_dimension_numbers<[1], [1], [0], [0], [0, 0, 1, 0], [], []>} : vector<8x4xf32>, vector<32x4xf32>, vector<8x32xf32> -> vector<8x32xf32>
    %c0_6 = arith.constant 0 : index
    %c0_7 = arith.constant 0 : index
    %6 = vector.load %arg3[%c0_6, %c0_7] : memref<1x32xf32, #tpu.memory_space<vmem>>, vector<1x32xf32>
    %7 = vector.broadcast %6 : vector<1x32xf32> to vector<8x32xf32>
    %8 = arith.addf %5, %7 : vector<8x32xf32>
    %c0_8 = arith.constant 0 : index
    %c0_9 = arith.constant 0 : index
    %9 = vector.load %arg4[%c0_8, %c0_9] : memref<8x32xf32, #tpu.memory_space<vmem>>, vector<8x32xf32>
    tpu.vector_store %arg4[%c0_8, %c0_9], %8 {strides = array<i32>} : memref<8x32xf32, #tpu.memory_space<vmem>>, vector<8x32xf32>,
    return
  }
  func.func @transform_0(%arg0: i32) -> (i32, i32, i32) {
    %c0_i32 = arith.constant 0 : i32
    %c0_i32_0 = arith.constant 0 : i32
    %c0_i32_1 = arith.constant 0 : i32
    return %arg0, %c0_i32, %c0_i32_0 : i32, i32, i32
  }
  func.func @transform_1(%arg0: i32) -> (i32, i32) {
    %c0_i32 = arith.constant 0 : i32
    %c0_i32_0 = arith.constant 0 : i32
    %c0_i32_1 = arith.constant 0 : i32
    return %c0_i32, %c0_i32_0 : i32, i32
  }
  func.func @transform_2(%arg0: i32) -> (i32, i32) {
    %c0_i32 = arith.constant 0 : i32
    %c0_i32_0 = arith.constant 0 : i32
    %c0_i32_1 = arith.constant 0 : i32
    return %c0_i32, %c0_i32_0 : i32, i32
  }
  func.func @transform_3(%arg0: i32) -> (i32, i32) {
    %c0_i32 = arith.constant 0 : i32
    %c0_i32_0 = arith.constant 0 : i32
    return %arg0, %c0_i32 : i32, i32
  }
}

module attributes {stable_mosaic.version = 11 : i64} {
  func.func @_update_cov_kernel(%arg0: i32, %arg1: memref<8x32xf32, #tpu.memory_space<vmem>>, %arg2: memref<8x1xi32, #tpu.memory_space<vmem>>, %arg3: memref<2x1x32xf32, #tpu.memory_space<vmem>>, %arg4: memref<2x1x1xf32, #tpu.memory_space<vmem>>, %arg5: memref<2x32x32xf32, #tpu.memory_space<vmem>>, %arg6: memref<128x32xf32, #tpu.memory_space<vmem>>, %arg7: memref<2x32x32xf32, #tpu.memory_space<vmem>>, %arg8: memref<2x1x32xf32, #tpu.memory_space<vmem>>, %arg9: memref<2x1x1xf32, #tpu.memory_space<vmem>>, %arg10: memref<2x128x1xf32, #tpu.memory_space<vmem>>) attributes {dimension_semantics = [#tpu.dimension_semantics<parallel>], iteration_bounds = array<i64: 5>, scalar_prefetch = 0 : i64, scratch_operands = 0 : i64, tpu.core_type = #tpu.core_type<tc>, window_params = [{pipeline_mode = #tpu.pipeline_mode<synchronous>, transform_indices = @transform_0, window_bounds = array<i64: 8, 32>}, {pipeline_mode = #tpu.pipeline_mode<synchronous>, transform_indices = @transform_1, window_bounds = array<i64: 8, 1>}, {transform_indices = @transform_2, window_bounds = array<i64: 2, 1, 32>}, {transform_indices = @transform_3, window_bounds = array<i64: 2, 1, 1>}, {transform_indices = @transform_4, window_bounds = array<i64: 2, 32, 32>}, {pipeline_mode = #tpu.pipeline_mode<synchronous>, transform_indices = @transform_5, window_bounds = array<i64: 128, 32>}, {transform_indices = @transform_6, window_bounds = array<i64: 2, 32, 32>}, {transform_indices = @transform_7, window_bounds = array<i64: 2, 1, 32>}, {transform_indices = @transform_8, window_bounds = array<i64: 2, 1, 1>}, {transform_indices = @transform_9, window_bounds = array<i64: 2, 128, 1>}]} {
    %c2_i32 = arith.constant 2 : i32
    %0 = arith.muli %arg0, %c2_i32 : i32
    %c0 = arith.constant 0 : index
    %c0_0 = arith.constant 0 : index
    %1 = vector.load %arg1[%c0, %c0_0] : memref<8x32xf32, #tpu.memory_space<vmem>>, vector<8x32xf32>
    %c0_1 = arith.constant 0 : index
    %c0_2 = arith.constant 0 : index
    %2 = vector.load %arg2[%c0_1, %c0_2] : memref<8x1xi32, #tpu.memory_space<vmem>>, vector<8x1xi32>
    %c0_3 = arith.constant 0 : index
    %c0_4 = arith.constant 0 : index
    %3 = vector.load %arg6[%c0_3, %c0_4] : memref<128x32xf32, #tpu.memory_space<vmem>>, vector<128x32xf32>
    %c0_i32 = arith.constant 0 : i32
    %4 = arith.addi %0, %c0_i32 : i32
    %5 = vector.broadcast %4 : i32 to vector<8x1xi32>
    %6 = arith.cmpi eq, %2, %5 : vector<8x1xi32>
    %7 = arith.extui %6 : vector<8x1xi1> to vector<8x1xi32>
    %8 = arith.sitofp %7 : vector<8x1xi32> to vector<8x1xf32>
    %cst = arith.constant dense<0.000000e+00> : vector<1xf32>
    %9 = vector.multi_reduction <add>, %8, %cst [0] : vector<8x1xf32> to vector<1xf32>
    %10 = vector.shape_cast %9 : vector<1xf32> to vector<1x1xf32>
    %cst_5 = arith.constant 1.000000e+00 : f32
    %11 = vector.broadcast %cst_5 : f32 to vector<1x1xf32>
    %12 = arith.maximumf %10, %11 : vector<1x1xf32>
    %13 = vector.broadcast %8 : vector<8x1xf32> to vector<8x32xf32>
    %14 = arith.mulf %1, %13 : vector<8x32xf32>
    %cst_6 = arith.constant dense<0.000000e+00> : vector<32xf32>
    %15 = vector.multi_reduction <add>, %14, %cst_6 [0] : vector<8x32xf32> to vector<32xf32>
    %16 = vector.shape_cast %15 : vector<32xf32> to vector<1x32xf32>
    %17 = vector.broadcast %12 : vector<1x1xf32> to vector<1x32xf32>
    %18 = arith.divf %16, %17 : vector<1x32xf32>
    %19 = vector.broadcast %18 : vector<1x32xf32> to vector<8x32xf32>
    %20 = arith.subf %1, %19 : vector<8x32xf32>
    %21 = vector.broadcast %8 : vector<8x1xf32> to vector<8x32xf32>
    %22 = arith.mulf %20, %21 : vector<8x32xf32>
    %cst_7 = arith.constant dense<0.000000e+00> : vector<32x32xf32>
    %23 = tpu.matmul %22, %1, %cst_7 {dimension_numbers = #tpu.dot_dimension_numbers<[0], [0], [1], [1], [0, 1, 1, 1], [], []>} : vector<8x32xf32>, vector<8x32xf32>, vector<32x32xf32> -> vector<32x32xf32>
    %24 = vector.broadcast %12 : vector<1x1xf32> to vector<32x32xf32>
    %25 = arith.divf %23, %24 : vector<32x32xf32>
    %c0_8 = arith.constant 0 : index
    %c0_9 = arith.constant 0 : index
    %c0_10 = arith.constant 0 : index
    %26 = vector.load %arg4[%c0_8, %c0_9, %c0_10] : memref<2x1x1xf32, #tpu.memory_space<vmem>>, vector<1x1x1xf32>
    %27 = vector.shape_cast %26 : vector<1x1x1xf32> to vector<1x1xf32>
    %28 = arith.addf %10, %27 : vector<1x1xf32>
    %cst_11 = arith.constant 0.000000e+00 : f32
    %29 = vector.broadcast %cst_11 : f32 to vector<1x1xf32>
    %30 = arith.cmpf ogt, %28, %29 : vector<1x1xf32>
    %cst_12 = arith.constant 0.000000e+00 : f32
    %31 = vector.broadcast %cst_12 : f32 to vector<1x1xf32>
    %32 = arith.cmpf ogt, %28, %31 : vector<1x1xf32>
    %cst_13 = arith.constant 1.000000e+00 : f32
    %33 = vector.broadcast %cst_13 : f32 to vector<1x1xf32>
    %34 = arith.select %32, %28, %33 : vector<1x1xi1>, vector<1x1xf32>
    %35 = arith.divf %10, %34 : vector<1x1xf32>
    %cst_14 = arith.constant 0.000000e+00 : f32
    %36 = vector.broadcast %cst_14 : f32 to vector<1x1xf32>
    %37 = arith.select %30, %35, %36 : vector<1x1xi1>, vector<1x1xf32>
    %c0_15 = arith.constant 0 : index
    %c0_16 = arith.constant 0 : index
    %c0_17 = arith.constant 0 : index
    %38 = vector.load %arg3[%c0_15, %c0_16, %c0_17] : memref<2x1x32xf32, #tpu.memory_space<vmem>>, vector<1x1x32xf32>
    %39 = vector.shape_cast %38 : vector<1x1x32xf32> to vector<1x32xf32>
    %40 = arith.subf %39, %18 : vector<1x32xf32>
    %cst_18 = arith.constant dense<0.000000e+00> : vector<32x32xf32>
    %41 = tpu.matmul %40, %40, %cst_18 {dimension_numbers = #tpu.dot_dimension_numbers<[0], [0], [1], [1], [0, 1, 1, 1], [], []>} : vector<1x32xf32>, vector<1x32xf32>, vector<32x32xf32> -> vector<32x32xf32>
    %c0_19 = arith.constant 0 : index
    %c0_20 = arith.constant 0 : index
    %c0_21 = arith.constant 0 : index
    %42 = vector.load %arg5[%c0_19, %c0_20, %c0_21] : memref<2x32x32xf32, #tpu.memory_space<vmem>>, vector<1x32x32xf32>
    %43 = vector.shape_cast %42 : vector<1x32x32xf32> to vector<32x32xf32>
    %cst_22 = arith.constant 1.000000e+00 : f32
    %44 = vector.broadcast %cst_22 : f32 to vector<1x1xf32>
    %45 = arith.subf %44, %37 : vector<1x1xf32>
    %46 = vector.broadcast %45 : vector<1x1xf32> to vector<32x32xf32>
    %47 = arith.mulf %43, %46 : vector<32x32xf32>
    %48 = vector.broadcast %37 : vector<1x1xf32> to vector<32x32xf32>
    %49 = arith.mulf %25, %48 : vector<32x32xf32>
    %50 = arith.addf %47, %49 : vector<32x32xf32>
    %cst_23 = arith.constant 1.000000e+00 : f32
    %51 = vector.broadcast %cst_23 : f32 to vector<1x1xf32>
    %52 = arith.subf %51, %37 : vector<1x1xf32>
    %53 = arith.mulf %37, %52 : vector<1x1xf32>
    %54 = vector.broadcast %53 : vector<1x1xf32> to vector<32x32xf32>
    %55 = arith.mulf %54, %41 : vector<32x32xf32>
    %56 = arith.addf %50, %55 : vector<32x32xf32>
    %c0_24 = arith.constant 0 : index
    %c0_25 = arith.constant 0 : index
    %c0_26 = arith.constant 0 : index
    %57 = vector.load %arg7[%c0_24, %c0_25, %c0_26] : memref<2x32x32xf32, #tpu.memory_space<vmem>>, vector<1x32x32xf32>
    %58 = vector.shape_cast %57 : vector<1x32x32xf32> to vector<32x32xf32>
    %59 = vector.shape_cast %56 : vector<32x32xf32> to vector<1x32x32xf32>
    tpu.vector_store %arg7[%c0_24, %c0_25, %c0_26], %59 {strides = array<i32>} : memref<2x32x32xf32, #tpu.memory_space<vmem>>, vector<1x32x32xf32>,
    %cst_27 = arith.constant 1.000000e+00 : f32
    %60 = vector.broadcast %cst_27 : f32 to vector<1x1xf32>
    %61 = arith.subf %60, %37 : vector<1x1xf32>
    %62 = vector.broadcast %61 : vector<1x1xf32> to vector<1x32xf32>
    %63 = arith.mulf %39, %62 : vector<1x32xf32>
    %64 = vector.broadcast %37 : vector<1x1xf32> to vector<1x32xf32>
    %65 = arith.mulf %18, %64 : vector<1x32xf32>
    %66 = arith.addf %63, %65 : vector<1x32xf32>
    %c0_28 = arith.constant 0 : index
    %c0_29 = arith.constant 0 : index
    %c0_30 = arith.constant 0 : index
    %67 = vector.load %arg8[%c0_28, %c0_29, %c0_30] : memref<2x1x32xf32, #tpu.memory_space<vmem>>, vector<1x1x32xf32>
    %68 = vector.shape_cast %67 : vector<1x1x32xf32> to vector<1x32xf32>
    %69 = vector.shape_cast %66 : vector<1x32xf32> to vector<1x1x32xf32>
    tpu.vector_store %arg8[%c0_28, %c0_29, %c0_30], %69 {strides = array<i32>} : memref<2x1x32xf32, #tpu.memory_space<vmem>>, vector<1x1x32xf32>,
    %70 = arith.addf %27, %10 : vector<1x1xf32>
    %c0_31 = arith.constant 0 : index
    %c0_32 = arith.constant 0 : index
    %c0_33 = arith.constant 0 : index
    %71 = vector.load %arg9[%c0_31, %c0_32, %c0_33] : memref<2x1x1xf32, #tpu.memory_space<vmem>>, vector<1x1x1xf32>
    %72 = vector.shape_cast %71 : vector<1x1x1xf32> to vector<1x1xf32>
    %73 = vector.shape_cast %70 : vector<1x1xf32> to vector<1x1x1xf32>
    tpu.vector_store %arg9[%c0_31, %c0_32, %c0_33], %73 {strides = array<i32>} : memref<2x1x1xf32, #tpu.memory_space<vmem>>, vector<1x1x1xf32>,
    %74 = arith.index_cast %4 : i32 to index
    %c0_34 = arith.constant 0 : index
    %75 = vector.load %arg6[%74, %c0_34] : memref<128x32xf32, #tpu.memory_space<vmem>>, vector<1x32xf32>
    %76 = vector.broadcast %75 : vector<1x32xf32> to vector<128x32xf32>
    %77 = arith.subf %3, %76 : vector<128x32xf32>
    %cst_35 = arith.constant dense<0.000000e+00> : vector<128x32xf32>
    %78 = tpu.matmul %77, %56, %cst_35 {dimension_numbers = #tpu.dot_dimension_numbers<[1], [0], [0], [1], [0, 0, 1, 1], [], []>} : vector<128x32xf32>, vector<32x32xf32>, vector<128x32xf32> -> vector<128x32xf32>
    %79 = arith.mulf %78, %77 : vector<128x32xf32>
    %cst_36 = arith.constant dense<0.000000e+00> : vector<128xf32>
    %80 = vector.multi_reduction <add>, %79, %cst_36 [1] : vector<128x32xf32> to vector<128xf32>
    %81 = vector.shape_cast %80 : vector<128xf32> to vector<128x1xf32>
    %c0_37 = arith.constant 0 : index
    %c0_38 = arith.constant 0 : index
    %c0_39 = arith.constant 0 : index
    %82 = vector.load %arg10[%c0_37, %c0_38, %c0_39] : memref<2x128x1xf32, #tpu.memory_space<vmem>>, vector<1x128x1xf32>
    %83 = vector.shape_cast %82 : vector<1x128x1xf32> to vector<128x1xf32>
    %84 = vector.shape_cast %81 : vector<128x1xf32> to vector<1x128x1xf32>
    tpu.vector_store %arg10[%c0_37, %c0_38, %c0_39], %84 {strides = array<i32>} : memref<2x128x1xf32, #tpu.memory_space<vmem>>, vector<1x128x1xf32>,
    %c1_i32 = arith.constant 1 : i32
    %85 = arith.addi %0, %c1_i32 : i32
    %86 = vector.broadcast %85 : i32 to vector<8x1xi32>
    %87 = arith.cmpi eq, %2, %86 : vector<8x1xi32>
    %88 = arith.extui %87 : vector<8x1xi1> to vector<8x1xi32>
    %89 = arith.sitofp %88 : vector<8x1xi32> to vector<8x1xf32>
    %cst_40 = arith.constant dense<0.000000e+00> : vector<1xf32>
    %90 = vector.multi_reduction <add>, %89, %cst_40 [0] : vector<8x1xf32> to vector<1xf32>
    %91 = vector.shape_cast %90 : vector<1xf32> to vector<1x1xf32>
    %cst_41 = arith.constant 1.000000e+00 : f32
    %92 = vector.broadcast %cst_41 : f32 to vector<1x1xf32>
    %93 = arith.maximumf %91, %92 : vector<1x1xf32>
    %94 = vector.broadcast %89 : vector<8x1xf32> to vector<8x32xf32>
    %95 = arith.mulf %1, %94 : vector<8x32xf32>
    %cst_42 = arith.constant dense<0.000000e+00> : vector<32xf32>
    %96 = vector.multi_reduction <add>, %95, %cst_42 [0] : vector<8x32xf32> to vector<32xf32>
    %97 = vector.shape_cast %96 : vector<32xf32> to vector<1x32xf32>
    %98 = vector.broadcast %93 : vector<1x1xf32> to vector<1x32xf32>
    %99 = arith.divf %97, %98 : vector<1x32xf32>
    %100 = vector.broadcast %99 : vector<1x32xf32> to vector<8x32xf32>
    %101 = arith.subf %1, %100 : vector<8x32xf32>
    %102 = vector.broadcast %89 : vector<8x1xf32> to vector<8x32xf32>
    %103 = arith.mulf %101, %102 : vector<8x32xf32>
    %cst_43 = arith.constant dense<0.000000e+00> : vector<32x32xf32>
    %104 = tpu.matmul %103, %1, %cst_43 {dimension_numbers = #tpu.dot_dimension_numbers<[0], [0], [1], [1], [0, 1, 1, 1], [], []>} : vector<8x32xf32>, vector<8x32xf32>, vector<32x32xf32> -> vector<32x32xf32>
    %105 = vector.broadcast %93 : vector<1x1xf32> to vector<32x32xf32>
    %106 = arith.divf %104, %105 : vector<32x32xf32>
    %c1 = arith.constant 1 : index
    %c0_44 = arith.constant 0 : index
    %c0_45 = arith.constant 0 : index
    %107 = vector.load %arg4[%c1, %c0_44, %c0_45] : memref<2x1x1xf32, #tpu.memory_space<vmem>>, vector<1x1x1xf32>
    %108 = vector.shape_cast %107 : vector<1x1x1xf32> to vector<1x1xf32>
    %109 = arith.addf %91, %108 : vector<1x1xf32>
    %cst_46 = arith.constant 0.000000e+00 : f32
    %110 = vector.broadcast %cst_46 : f32 to vector<1x1xf32>
    %111 = arith.cmpf ogt, %109, %110 : vector<1x1xf32>
    %cst_47 = arith.constant 0.000000e+00 : f32
    %112 = vector.broadcast %cst_47 : f32 to vector<1x1xf32>
    %113 = arith.cmpf ogt, %109, %112 : vector<1x1xf32>
    %cst_48 = arith.constant 1.000000e+00 : f32
    %114 = vector.broadcast %cst_48 : f32 to vector<1x1xf32>
    %115 = arith.select %113, %109, %114 : vector<1x1xi1>, vector<1x1xf32>
    %116 = arith.divf %91, %115 : vector<1x1xf32>
    %cst_49 = arith.constant 0.000000e+00 : f32
    %117 = vector.broadcast %cst_49 : f32 to vector<1x1xf32>
    %118 = arith.select %111, %116, %117 : vector<1x1xi1>, vector<1x1xf32>
    %c1_50 = arith.constant 1 : index
    %c0_51 = arith.constant 0 : index
    %c0_52 = arith.constant 0 : index
    %119 = vector.load %arg3[%c1_50, %c0_51, %c0_52] : memref<2x1x32xf32, #tpu.memory_space<vmem>>, vector<1x1x32xf32>
    %120 = vector.shape_cast %119 : vector<1x1x32xf32> to vector<1x32xf32>
    %121 = arith.subf %120, %99 : vector<1x32xf32>
    %cst_53 = arith.constant dense<0.000000e+00> : vector<32x32xf32>
    %122 = tpu.matmul %121, %121, %cst_53 {dimension_numbers = #tpu.dot_dimension_numbers<[0], [0], [1], [1], [0, 1, 1, 1], [], []>} : vector<1x32xf32>, vector<1x32xf32>, vector<32x32xf32> -> vector<32x32xf32>
    %c1_54 = arith.constant 1 : index
    %c0_55 = arith.constant 0 : index
    %c0_56 = arith.constant 0 : index
    %123 = vector.load %arg5[%c1_54, %c0_55, %c0_56] : memref<2x32x32xf32, #tpu.memory_space<vmem>>, vector<1x32x32xf32>
    %124 = vector.shape_cast %123 : vector<1x32x32xf32> to vector<32x32xf32>
    %cst_57 = arith.constant 1.000000e+00 : f32
    %125 = vector.broadcast %cst_57 : f32 to vector<1x1xf32>
    %126 = arith.subf %125, %118 : vector<1x1xf32>
    %127 = vector.broadcast %126 : vector<1x1xf32> to vector<32x32xf32>
    %128 = arith.mulf %124, %127 : vector<32x32xf32>
    %129 = vector.broadcast %118 : vector<1x1xf32> to vector<32x32xf32>
    %130 = arith.mulf %106, %129 : vector<32x32xf32>
    %131 = arith.addf %128, %130 : vector<32x32xf32>
    %cst_58 = arith.constant 1.000000e+00 : f32
    %132 = vector.broadcast %cst_58 : f32 to vector<1x1xf32>
    %133 = arith.subf %132, %118 : vector<1x1xf32>
    %134 = arith.mulf %118, %133 : vector<1x1xf32>
    %135 = vector.broadcast %134 : vector<1x1xf32> to vector<32x32xf32>
    %136 = arith.mulf %135, %122 : vector<32x32xf32>
    %137 = arith.addf %131, %136 : vector<32x32xf32>
    %c1_59 = arith.constant 1 : index
    %c0_60 = arith.constant 0 : index
    %c0_61 = arith.constant 0 : index
    %138 = vector.load %arg7[%c1_59, %c0_60, %c0_61] : memref<2x32x32xf32, #tpu.memory_space<vmem>>, vector<1x32x32xf32>
    %139 = vector.shape_cast %138 : vector<1x32x32xf32> to vector<32x32xf32>
    %140 = vector.shape_cast %137 : vector<32x32xf32> to vector<1x32x32xf32>
    tpu.vector_store %arg7[%c1_59, %c0_60, %c0_61], %140 {strides = array<i32>} : memref<2x32x32xf32, #tpu.memory_space<vmem>>, vector<1x32x32xf32>,
    %cst_62 = arith.constant 1.000000e+00 : f32
    %141 = vector.broadcast %cst_62 : f32 to vector<1x1xf32>
    %142 = arith.subf %141, %118 : vector<1x1xf32>
    %143 = vector.broadcast %142 : vector<1x1xf32> to vector<1x32xf32>
    %144 = arith.mulf %120, %143 : vector<1x32xf32>
    %145 = vector.broadcast %118 : vector<1x1xf32> to vector<1x32xf32>
    %146 = arith.mulf %99, %145 : vector<1x32xf32>
    %147 = arith.addf %144, %146 : vector<1x32xf32>
    %c1_63 = arith.constant 1 : index
    %c0_64 = arith.constant 0 : index
    %c0_65 = arith.constant 0 : index
    %148 = vector.load %arg8[%c1_63, %c0_64, %c0_65] : memref<2x1x32xf32, #tpu.memory_space<vmem>>, vector<1x1x32xf32>
    %149 = vector.shape_cast %148 : vector<1x1x32xf32> to vector<1x32xf32>
    %150 = vector.shape_cast %147 : vector<1x32xf32> to vector<1x1x32xf32>
    tpu.vector_store %arg8[%c1_63, %c0_64, %c0_65], %150 {strides = array<i32>} : memref<2x1x32xf32, #tpu.memory_space<vmem>>, vector<1x1x32xf32>,
    %151 = arith.addf %108, %91 : vector<1x1xf32>
    %c1_66 = arith.constant 1 : index
    %c0_67 = arith.constant 0 : index
    %c0_68 = arith.constant 0 : index
    %152 = vector.load %arg9[%c1_66, %c0_67, %c0_68] : memref<2x1x1xf32, #tpu.memory_space<vmem>>, vector<1x1x1xf32>
    %153 = vector.shape_cast %152 : vector<1x1x1xf32> to vector<1x1xf32>
    %154 = vector.shape_cast %151 : vector<1x1xf32> to vector<1x1x1xf32>
    tpu.vector_store %arg9[%c1_66, %c0_67, %c0_68], %154 {strides = array<i32>} : memref<2x1x1xf32, #tpu.memory_space<vmem>>, vector<1x1x1xf32>,
    %155 = arith.index_cast %85 : i32 to index
    %c0_69 = arith.constant 0 : index
    %156 = vector.load %arg6[%155, %c0_69] : memref<128x32xf32, #tpu.memory_space<vmem>>, vector<1x32xf32>
    %157 = vector.broadcast %156 : vector<1x32xf32> to vector<128x32xf32>
    %158 = arith.subf %3, %157 : vector<128x32xf32>
    %cst_70 = arith.constant dense<0.000000e+00> : vector<128x32xf32>
    %159 = tpu.matmul %158, %137, %cst_70 {dimension_numbers = #tpu.dot_dimension_numbers<[1], [0], [0], [1], [0, 0, 1, 1], [], []>} : vector<128x32xf32>, vector<32x32xf32>, vector<128x32xf32> -> vector<128x32xf32>
    %160 = arith.mulf %159, %158 : vector<128x32xf32>
    %cst_71 = arith.constant dense<0.000000e+00> : vector<128xf32>
    %161 = vector.multi_reduction <add>, %160, %cst_71 [1] : vector<128x32xf32> to vector<128xf32>
    %162 = vector.shape_cast %161 : vector<128xf32> to vector<128x1xf32>
    %c1_72 = arith.constant 1 : index
    %c0_73 = arith.constant 0 : index
    %c0_74 = arith.constant 0 : index
    %163 = vector.load %arg10[%c1_72, %c0_73, %c0_74] : memref<2x128x1xf32, #tpu.memory_space<vmem>>, vector<1x128x1xf32>
    %164 = vector.shape_cast %163 : vector<1x128x1xf32> to vector<128x1xf32>
    %165 = vector.shape_cast %162 : vector<128x1xf32> to vector<1x128x1xf32>
    tpu.vector_store %arg10[%c1_72, %c0_73, %c0_74], %165 {strides = array<i32>} : memref<2x128x1xf32, #tpu.memory_space<vmem>>, vector<1x128x1xf32>,
    return
  }
  func.func @transform_0(%arg0: i32) -> (i32, i32) {
    %c0_i32 = arith.constant 0 : i32
    %c0_i32_0 = arith.constant 0 : i32
    %c0_i32_1 = arith.constant 0 : i32
    return %c0_i32, %c0_i32_0 : i32, i32
  }
  func.func @transform_1(%arg0: i32) -> (i32, i32) {
    %c0_i32 = arith.constant 0 : i32
    %c0_i32_0 = arith.constant 0 : i32
    %c0_i32_1 = arith.constant 0 : i32
    return %c0_i32, %c0_i32_0 : i32, i32
  }
  func.func @transform_2(%arg0: i32) -> (i32, i32, i32) {
    %c0_i32 = arith.constant 0 : i32
    %c0_i32_0 = arith.constant 0 : i32
    %c0_i32_1 = arith.constant 0 : i32
    return %arg0, %c0_i32, %c0_i32_0 : i32, i32, i32
  }
  func.func @transform_3(%arg0: i32) -> (i32, i32, i32) {
    %c0_i32 = arith.constant 0 : i32
    %c0_i32_0 = arith.constant 0 : i32
    %c0_i32_1 = arith.constant 0 : i32
    return %arg0, %c0_i32, %c0_i32_0 : i32, i32, i32
  }
  func.func @transform_4(%arg0: i32) -> (i32, i32, i32) {
    %c0_i32 = arith.constant 0 : i32
    %c0_i32_0 = arith.constant 0 : i32
    %c0_i32_1 = arith.constant 0 : i32
    return %arg0, %c0_i32, %c0_i32_0 : i32, i32, i32
  }
  func.func @transform_5(%arg0: i32) -> (i32, i32) {
    %c0_i32 = arith.constant 0 : i32
    %c0_i32_0 = arith.constant 0 : i32
    %c0_i32_1 = arith.constant 0 : i32
    return %c0_i32, %c0_i32_0 : i32, i32
  }
  func.func @transform_6(%arg0: i32) -> (i32, i32, i32) {
    %c0_i32 = arith.constant 0 : i32
    %c0_i32_0 = arith.constant 0 : i32
    %c0_i32_1 = arith.constant 0 : i32
    return %arg0, %c0_i32, %c0_i32_0 : i32, i32, i32
  }
  func.func @transform_7(%arg0: i32) -> (i32, i32, i32) {
    %c0_i32 = arith.constant 0 : i32
    %c0_i32_0 = arith.constant 0 : i32
    %c0_i32_1 = arith.constant 0 : i32
    return %arg0, %c0_i32, %c0_i32_0 : i32, i32, i32
  }
  func.func @transform_8(%arg0: i32) -> (i32, i32, i32) {
    %c0_i32 = arith.constant 0 : i32
    %c0_i32_0 = arith.constant 0 : i32
    %c0_i32_1 = arith.constant 0 : i32
    return %arg0, %c0_i32, %c0_i32_0 : i32, i32, i32
  }
  func.func @transform_9(%arg0: i32) -> (i32, i32, i32) {
    %c0_i32 = arith.constant 0 : i32
    %c0_i32_0 = arith.constant 0 : i32
    %c0_i32_1 = arith.constant 0 : i32
    return %arg0, %c0_i32, %c0_i32_0 : i32, i32, i32
  }
}

module attributes {stable_mosaic.version = 11 : i64} {
  func.func @_fused_loss_kernel(%arg0: i32, %arg1: memref<8x32xf32, #tpu.memory_space<vmem>>, %arg2: memref<8x1xi32, #tpu.memory_space<vmem>>, %arg3: memref<128x32xf32, #tpu.memory_space<vmem>>, %arg4: memref<1x128xf32, #tpu.memory_space<vmem>>, %arg5: memref<128x128xf32, #tpu.memory_space<vmem>>, %arg6: memref<1x1xf32, #tpu.memory_space<vmem>>, %arg7: memref<8x128xf32, #tpu.memory_space<vmem>>, %arg8: memref<8x1xf32, #tpu.memory_space<vmem>>) attributes {dimension_semantics = [#tpu.dimension_semantics<parallel>], iteration_bounds = array<i64: 1>, scalar_prefetch = 0 : i64, scratch_operands = 0 : i64, tpu.core_type = #tpu.core_type<tc>, window_params = [{transform_indices = @transform_0, window_bounds = array<i64: 8, 32>}, {transform_indices = @transform_1, window_bounds = array<i64: 8, 1>}, {pipeline_mode = #tpu.pipeline_mode<synchronous>, transform_indices = @transform_2, window_bounds = array<i64: 128, 32>}, {pipeline_mode = #tpu.pipeline_mode<synchronous>, transform_indices = @transform_3, window_bounds = array<i64: 1, 128>}, {pipeline_mode = #tpu.pipeline_mode<synchronous>, transform_indices = @transform_4, window_bounds = array<i64: 128, 128>}, {pipeline_mode = #tpu.pipeline_mode<synchronous>, transform_indices = @transform_5, window_bounds = array<i64: 1, 1>}, {transform_indices = @transform_6, window_bounds = array<i64: 8, 128>}, {transform_indices = @transform_7, window_bounds = array<i64: 8, 1>}]} {
    %c0 = arith.constant 0 : index
    %c0_0 = arith.constant 0 : index
    %0 = vector.load %arg1[%c0, %c0_0] : memref<8x32xf32, #tpu.memory_space<vmem>>, vector<8x32xf32>
    %1 = arith.truncf %0 : vector<8x32xf32> to vector<8x32xbf16>
    %c0_1 = arith.constant 0 : index
    %c0_2 = arith.constant 0 : index
    %2 = vector.load %arg3[%c0_1, %c0_2] : memref<128x32xf32, #tpu.memory_space<vmem>>, vector<128x32xf32>
    %3 = arith.truncf %2 : vector<128x32xf32> to vector<128x32xbf16>
    %cst = arith.constant dense<0.000000e+00> : vector<8x128xf32>
    %4 = tpu.matmul %1, %3, %cst {dimension_numbers = #tpu.dot_dimension_numbers<[1], [1], [0], [0], [0, 0, 1, 0], [], []>} : vector<8x32xbf16>, vector<128x32xbf16>, vector<8x128xf32> -> vector<8x128xf32>
    %c0_3 = arith.constant 0 : index
    %c0_4 = arith.constant 0 : index
    %5 = vector.load %arg4[%c0_3, %c0_4] : memref<1x128xf32, #tpu.memory_space<vmem>>, vector<1x128xf32>
    %6 = vector.broadcast %5 : vector<1x128xf32> to vector<8x128xf32>
    %7 = arith.addf %4, %6 : vector<8x128xf32>
    %c0_5 = arith.constant 0 : index
    %c0_6 = arith.constant 0 : index
    %8 = vector.load %arg7[%c0_5, %c0_6] : memref<8x128xf32, #tpu.memory_space<vmem>>, vector<8x128xf32>
    tpu.vector_store %arg7[%c0_5, %c0_6], %7 {strides = array<i32>} : memref<8x128xf32, #tpu.memory_space<vmem>>, vector<8x128xf32>,
    %c0_7 = arith.constant 0 : index
    %c0_8 = arith.constant 0 : index
    %9 = vector.load %arg2[%c0_7, %c0_8] : memref<8x1xi32, #tpu.memory_space<vmem>>, vector<8x1xi32>
    %10 = tpu.iota {dimensions = array<i32: 1>} : vector<8x128xi32>
    %11 = vector.broadcast %9 : vector<8x1xi32> to vector<8x128xi32>
    %12 = arith.cmpi eq, %10, %11 : vector<8x128xi32>
    %13 = arith.extui %12 : vector<8x128xi1> to vector<8x128xi32>
    %14 = arith.sitofp %13 : vector<8x128xi32> to vector<8x128xf32>
    %c0_9 = arith.constant 0 : index
    %c0_10 = arith.constant 0 : index
    %15 = vector.load %arg5[%c0_9, %c0_10] : memref<128x128xf32, #tpu.memory_space<vmem>>, vector<128x128xf32>
    %cst_11 = arith.constant dense<0.000000e+00> : vector<8x128xf32>
    %16 = tpu.matmul %14, %15, %cst_11 {dimension_numbers = #tpu.dot_dimension_numbers<[1], [0], [0], [1], [0, 0, 1, 1], [], []>} : vector<8x128xf32>, vector<128x128xf32>, vector<8x128xf32> -> vector<8x128xf32>
    %c0_12 = arith.constant 0 : index
    %c0_13 = arith.constant 0 : index
    %17 = vector.load %arg6[%c0_12, %c0_13] : memref<1x1xf32, #tpu.memory_space<vmem>>, vector<1x1xf32>
    %cst_14 = arith.constant 5.000000e-01 : f32
    %18 = vector.broadcast %cst_14 : f32 to vector<1x1xf32>
    %19 = arith.mulf %18, %17 : vector<1x1xf32>
    %20 = vector.broadcast %19 : vector<1x1xf32> to vector<8x128xf32>
    %21 = arith.mulf %20, %16 : vector<8x128xf32>
    %22 = arith.addf %7, %21 : vector<8x128xf32>
    %cst_15 = arith.constant dense<0xFF800000> : vector<8xf32>
    %23 = vector.multi_reduction <maximumf>, %22, %cst_15 [1] : vector<8x128xf32> to vector<8xf32>
    %24 = vector.shape_cast %23 : vector<8xf32> to vector<8x1xf32>
    %25 = vector.broadcast %24 : vector<8x1xf32> to vector<8x128xf32>
    %26 = arith.subf %22, %25 : vector<8x128xf32>
    %27 = math.exp %26 : vector<8x128xf32>
    %cst_16 = arith.constant dense<0.000000e+00> : vector<8xf32>
    %28 = vector.multi_reduction <add>, %27, %cst_16 [1] : vector<8x128xf32> to vector<8xf32>
    %29 = vector.shape_cast %28 : vector<8xf32> to vector<8x1xf32>
    %30 = math.log %29 : vector<8x1xf32>
    %31 = arith.addf %24, %30 : vector<8x1xf32>
    %32 = arith.mulf %14, %22 : vector<8x128xf32>
    %cst_17 = arith.constant dense<0.000000e+00> : vector<8xf32>
    %33 = vector.multi_reduction <add>, %32, %cst_17 [1] : vector<8x128xf32> to vector<8xf32>
    %34 = vector.shape_cast %33 : vector<8xf32> to vector<8x1xf32>
    %35 = arith.subf %31, %34 : vector<8x1xf32>
    %c0_18 = arith.constant 0 : index
    %c0_19 = arith.constant 0 : index
    %36 = vector.load %arg8[%c0_18, %c0_19] : memref<8x1xf32, #tpu.memory_space<vmem>>, vector<8x1xf32>
    tpu.vector_store %arg8[%c0_18, %c0_19], %35 {strides = array<i32>} : memref<8x1xf32, #tpu.memory_space<vmem>>, vector<8x1xf32>,
    return
  }
  func.func @transform_0(%arg0: i32) -> (i32, i32) {
    %c0_i32 = arith.constant 0 : i32
    %c0_i32_0 = arith.constant 0 : i32
    return %arg0, %c0_i32 : i32, i32
  }
  func.func @transform_1(%arg0: i32) -> (i32, i32) {
    %c0_i32 = arith.constant 0 : i32
    %c0_i32_0 = arith.constant 0 : i32
    return %arg0, %c0_i32 : i32, i32
  }
  func.func @transform_2(%arg0: i32) -> (i32, i32) {
    %c0_i32 = arith.constant 0 : i32
    %c0_i32_0 = arith.constant 0 : i32
    %c0_i32_1 = arith.constant 0 : i32
    return %c0_i32, %c0_i32_0 : i32, i32
  }
  func.func @transform_3(%arg0: i32) -> (i32, i32) {
    %c0_i32 = arith.constant 0 : i32
    %c0_i32_0 = arith.constant 0 : i32
    %c0_i32_1 = arith.constant 0 : i32
    return %c0_i32, %c0_i32_0 : i32, i32
  }
  func.func @transform_4(%arg0: i32) -> (i32, i32) {
    %c0_i32 = arith.constant 0 : i32
    %c0_i32_0 = arith.constant 0 : i32
    %c0_i32_1 = arith.constant 0 : i32
    return %c0_i32, %c0_i32_0 : i32, i32
  }
  func.func @transform_5(%arg0: i32) -> (i32, i32) {
    %c0_i32 = arith.constant 0 : i32
    %c0_i32_0 = arith.constant 0 : i32
    %c0_i32_1 = arith.constant 0 : i32
    return %c0_i32, %c0_i32_0 : i32, i32
  }
  func.func @transform_6(%arg0: i32) -> (i32, i32) {
    %c0_i32 = arith.constant 0 : i32
    %c0_i32_0 = arith.constant 0 : i32
    return %arg0, %c0_i32 : i32, i32
  }
  func.func @transform_7(%arg0: i32) -> (i32, i32) {
    %c0_i32 = arith.constant 0 : i32
    %c0_i32_0 = arith.constant 0 : i32
    return %arg0, %c0_i32 : i32, i32
  }
}

</mosaic_0001>

<bundles_post_ra>
// kernel: isda_loss_forward.3
= control target key start
LH: loop header
LB: loop body
LE: loop exit
PB: predicated region body
PF: predicated region fallthrough
CT: control target
= control target key end

     0   :  { %vm73_vm0 = vcmask 1043456   ;;  %vm169_vm1 = vcmask 31744   ;;  %v219_v49 = vmov 256.0   ;;  %v145_v60 = vlaneseq  ;;  %s303_s0 = inlined_call_operand.vmem [shape: f32[8,4,256], index: 0, kind: input, shape index: {}]   ;;  %s304_s2 = inlined_call_operand.vmem [shape: f32[1,32], index: 2, kind: input, shape index: {}]   ;;  %s305_s1 = inlined_call_operand.vmem [shape: f32[32,4], index: 1, kind: input, shape index: {}]   ;;  %s306_s3 = inlined_call_operand.vmem [shape: f32[8,32], index: 3, kind: output, shape index: {}]  }
   0x1   :  { %v14_v0 = vld [vmem:[%s303_s0] sm:$0xff]  ;;  %v16_v1 = vld [vmem:[%s303_s0 + $0x10] sm:$0xff]  ;;  %v15_v2 = vld [vmem:[%s303_s0 + $0x8] sm:$0xff]  ;;  %217 = vrcp.f32 %v219_v49  ;;  %vm155_vm3 = vcmask 1041409   ;;  %vm157_vm4 = vcmask 1042434   ;;  %vm159_vm5 = vcmask 1043459  }
   0x2   :  { %30 = vst [vmem:[#allocation1] ss:$2 sm:$0xff] %v14_v0  ;;  %v17_v3 = vld [vmem:[%s303_s0 + $0x18] sm:$0xff]  ;;  %v18_v4 = vld [vmem:[%s303_s0 + $0x20] sm:$0xff]  ;;  %v20_v5 = vld [vmem:[%s303_s0 + $0x30] sm:$0xff]  ;;  %v146_v62 = vand.u32 127, %v145_v60 }
   0x3   :  { %38 = vst [vmem:[#allocation1 + $0x20] ss:$2 sm:$0xff] %v16_v1  ;;  %v19_v10 = vld [vmem:[%s303_s0 + $0x28] sm:$0xff]  ;;  %v21_v16 = vld [vmem:[%s303_s0 + $0x38] sm:$0xff]  ;;  %v131_v50 = vld [vmem:[%s305_s1 + $0x10] sm:$0xff]  ;;  %vm161_vm6 = vcmask 1044484  }
   0x4   :  { %34 = vst [vmem:[#allocation1 + $0x10] ss:$2 sm:$0xff] %v15_v2  ;;  %v132_v48 = vld [vmem:[%s305_s1 + $0x18] sm:$0xff]  ;;  %v130_v51 = vld [vmem:[%s305_s1 + $0x8] sm:$0xff]  ;;  %v129_v54 = vld [vmem:[%s305_s1] sm:$0xff]  ;;  %vm163_vm7 = vcmask 1045509  }
   0x5   :  { %42 = vst [vmem:[#allocation1 + $0x30] ss:$2 sm:$0xff] %v17_v3  ;;  %210 = vmatpush.xpose.msk.msra.mxu0 %vm169_vm1, %v132_v48  ;;  %vm165_vm8 = vcmask 1046534   ;;  %vm167_vm9 = vcmask 1047559   ;;  %vm204_vm10 = vcmask 261120  }
   0x7   :  { %v218_v52 = vpop.eup %217 }
   0x8   :  { %v115_v53 = vmul.f32 256.0, %v218_v52  ;;  %vm119_vm2 = vweird.f32 %v218_v52 }
   0x9   :  { %v31_v6 = vld.sshfl [vmem:[#allocation1] sm:$0xff pattern:$0x75316420]  ;;  %v32_v7 = vld.sshfl [vmem:[#allocation1 + $0x8] sm:$0xff pattern:$0x75316420]  ;;  %211 = vmatpush.xpose.msk.msra.mxu0 %vm169_vm1, %v131_v50 }
   0xa   :  { %v74_v8 = vsel %vm73_vm0, %v31_v6, 0.0  ;;  %v75_v9 = vsel %vm73_vm0, %v32_v7, 0.0  ;;  %45 = vst [vmem:[#allocation1] ss:$2 sm:$0xff] %v18_v4  ;;  %v116_v55 = vsub.f32 1.0, %v115_v53 }
   0xb   :  { %v76_v11 = vadd.f32 %v75_v9, %v74_v8  ;;  %v39_v12 = vld.sshfl [vmem:[#allocation1 + $0x20] sm:$0xff pattern:$0x75316420]  ;;  %v40_v13 = vld.sshfl [vmem:[#allocation1 + $0x28] sm:$0xff pattern:$0x75316420] }
   0xc   :  { %v84_v14 = vsel %vm73_vm0, %v39_v12, 0.0  ;;  %v85_v15 = vsel %vm73_vm0, %v40_v13, 0.0  ;;  %51 = vst [vmem:[#allocation1 + $0x20] ss:$2 sm:$0xff] %v20_v5  ;;  %v117_v56 = vmul.f32 %v218_v52, %v116_v55 }
   0xd   :  { %77 = vadd.xlane.f32.xlu0 %v76_v11  ;;  %v86_v17 = vadd.f32 %v85_v15, %v84_v14  ;;  %v35_v18 = vld.sshfl [vmem:[#allocation1 + $0x10] sm:$0xff pattern:$0x75316420]  ;;  %v36_v19 = vld.sshfl [vmem:[#allocation1 + $0x18] sm:$0xff pattern:$0x75316420]  ;;  %212 = vmatpush.xpose.msk.msra.mxu0 %vm169_vm1, %v130_v51 }
   0xe   :  { %48 = vst [vmem:[#allocation1 + $0x10] ss:$2 sm:$0xff] %v19_v10  ;;  %v79_v20 = vsel %vm73_vm0, %v35_v18, 0.0  ;;  %v80_v21 = vsel %vm73_vm0, %v36_v19, 0.0  ;;  %v118_v57 = vadd.f32 %v218_v52, %v117_v56 }
   0xf   :  { %87 = vadd.xlane.f32.xlu1 %v86_v17  ;;  %v43_v22 = vld.sshfl [vmem:[#allocation1 + $0x30] sm:$0xff pattern:$0x75316420]  ;;  %v44_v23 = vld.sshfl [vmem:[#allocation1 + $0x38] sm:$0xff pattern:$0x75316420]  ;;  %v81_v26 = vadd.f32 %v80_v21, %v79_v20 }
  0x10   :  { %54 = vst [vmem:[#allocation1 + $0x30] ss:$2 sm:$0xff] %v21_v16  ;;  %v89_v24 = vsel %vm73_vm0, %v43_v22, 0.0  ;;  %v90_v25 = vsel %vm73_vm0, %v44_v23, 0.0  ;;  %v120_v61 = vsel %vm119_vm2, %v218_v52, %v118_v57 }
  0x11   :  { %v46_v27 = vld.sshfl [vmem:[#allocation1] sm:$0xff pattern:$0x75316420]  ;;  %v47_v28 = vld.sshfl [vmem:[#allocation1 + $0x8] sm:$0xff pattern:$0x75316420]  ;;  %v91_v32 = vadd.f32 %v90_v25, %v89_v24  ;;  %213 = vmatpush.xpose.msk.msra.mxu0 %vm169_vm1, %v129_v54 }
  0x12   :  { %v94_v29 = vsel %vm73_vm0, %v46_v27, 0.0  ;;  %v95_v30 = vsel %vm73_vm0, %v47_v28, 0.0  ;;  %v216_v28 = vld [vmem:[%s304_s2] ss:$0 sm:$0xff] }
  0x13   :  { %v96_v31 = vadd.f32 %v95_v30, %v94_v29  ;;  %v52_v33 = vld.sshfl [vmem:[#allocation1 + $0x20] sm:$0xff pattern:$0x75316420]  ;;  %v53_v34 = vld.sshfl [vmem:[#allocation1 + $0x28] sm:$0xff pattern:$0x75316420] }
  0x14   :  { %v104_v39 = vsel %vm73_vm0, %v52_v33, 0.0  ;;  %v105_v40 = vsel %vm73_vm0, %v53_v34, 0.0 }
  0x15   :  { %82 = vadd.xlane.f32.xlu0 %v81_v26  ;;  %97 = vadd.xlane.f32.xlu2 %v96_v31  ;;  %v49_v35 = vld.sshfl [vmem:[#allocation1 + $0x10] sm:$0xff pattern:$0x75316420]  ;;  %v50_v36 = vld.sshfl [vmem:[#allocation1 + $0x18] sm:$0xff pattern:$0x75316420]  ;;  %v106_v46 = vadd.f32 %v105_v40, %v104_v39 }
  0x16   :  { %v99_v37 = vsel %vm73_vm0, %v49_v35, 0.0  ;;  %v100_v38 = vsel %vm73_vm0, %v50_v36, 0.0 }
  0x17   :  { %92 = vadd.xlane.f32.xlu1 %v91_v32  ;;  %v55_v41 = vld.sshfl [vmem:[#allocation1 + $0x30] sm:$0xff pattern:$0x75316420]  ;;  %v56_v42 = vld.sshfl [vmem:[#allocation1 + $0x38] sm:$0xff pattern:$0x75316420]  ;;  %v101_v45 = vadd.f32 %v100_v38, %v99_v37 }
  0x18   :  { %v109_v43 = vsel %vm73_vm0, %v55_v41, 0.0  ;;  %v110_v44 = vsel %vm73_vm0, %v56_v42, 0.0 }
  0x19   :  { %v111_v47 = vadd.f32 %v110_v44, %v109_v43 }
  0x1d   :  { %102 = vadd.xlane.f32.xlu2 %v101_v45  ;;  %107 = vadd.xlane.f32.xlu0 %v106_v46 }
  0x1f   :  { %112 = vadd.xlane.f32.xlu1 %v111_v47 }
  0x80   :  { %v78_v58 = vpop.xlane.xlu0 %77 }
  0x81   :  { %v121_v63 = vmul.f32 %v120_v61, %v78_v58 }
  0x82   :  { %v88_v59 = vpop.xlane.xlu1 %87 }
  0x83   :  { %v123_v0 = vmul.f32 %v120_v61, %v88_v59  ;;  %v147_v5 = vperm.slane %v121_v63, %v146_v62 }
  0x85   :  { %v149_v8 = vperm.slane %v123_v0, %v146_v62 }
  0x88   :  { %v83_v1 = vpop.xlane.xlu0 %82  ;;  %v98_v2 = vpop.xlane.xlu2 %97 }
  0x89   :  { %v122_v3 = vmul.f32 %v120_v61, %v83_v1  ;;  %v125_v11 = vmul.f32 %v120_v61, %v98_v2 }
  0x8a   :  { %v93_v4 = vpop.xlane.xlu1 %92 }
  0x8b   :  { %v148_v6 = vperm.slane %v122_v3, %v146_v62  ;;  %v124_v7 = vmul.f32 %v120_v61, %v93_v4  ;;  %v151_v18 = vperm.slane %v125_v11, %v146_v62 }
  0x8d   :  { %v156_v9 = vsel %vm155_vm3, %v148_v6, %v147_v5  ;;  %v150_v10 = vperm.slane %v124_v7, %v146_v62 }
  0x8e   :  { %v158_v12 = vsel %vm157_vm4, %v149_v8, %v156_v9 }
  0x8f   :  { %v160_v15 = vsel %vm159_vm5, %v150_v10, %v158_v12 }
  0x90   :  { %v103_v13 = vpop.xlane.xlu2 %102  ;;  %v108_v14 = vpop.xlane.xlu0 %107  ;;  %v162_v23 = vsel %vm161_vm6, %v151_v18, %v160_v15 }
  0x91   :  { %v126_v16 = vmul.f32 %v120_v61, %v103_v13  ;;  %v127_v17 = vmul.f32 %v120_v61, %v108_v14 }
  0x92   :  { %v113_v19 = vpop.xlane.xlu1 %112 }
  0x93   :  { %v152_v20 = vperm.slane %v126_v16, %v146_v62  ;;  %v153_v21 = vperm.slane %v127_v17, %v146_v62  ;;  %v128_v22 = vmul.f32 %v120_v61, %v113_v19 }
  0x95   :  { %v154_v24 = vperm.slane %v128_v22, %v146_v62  ;;  %v164_v25 = vsel %vm163_vm7, %v152_v20, %v162_v23 }
  0x96   :  { %v166_v26 = vsel %vm165_vm8, %v153_v21, %v164_v25 }
  0x97   :  { %v168_v27 = vsel %vm167_vm9, %v154_v24, %v166_v26 }
  0x98   :  { %214 = vmatmul.msk.f32.vlgmr.msra.gmra.mxu0 %vm169_vm1, %v168_v27 }
 0x115   :  { %v201_v29 = vpop.f32.mrf.mxu0 }
 0x116   :  { %v202_v30 = vadd.f32 %v216_v28, %v201_v29 }
 0x118   :  { %205 = vst.msk [vmem:[%s306_s3] sm:$0xff] %vm204_vm10, %v202_v30 }

// kernel: isda_loss_forward.5
= control target key start
LH: loop header
LB: loop body
LE: loop exit
PB: predicated region body
PF: predicated region fallthrough
CT: control target
= control target key end

     0   :  { %s397_s0 = inlined_call_operand.vmem [shape: f32[8,32], index: 0, kind: input, shape index: {}]   ;;  %s398_s1 = inlined_call_operand.vmem [shape: s32[8,1], index: 1, kind: input, shape index: {}]   ;;  %s399_s2 = inlined_call_operand.vmem [shape: f32[128,32], index: 2, kind: input, shape index: {}]   ;;  %s400_s3 = inlined_call_operand.vmem [shape: f32[1,128], index: 3, kind: input, shape index: {}]   ;;  %s401_s4 = inlined_call_operand.vmem [shape: f32[128,128], index: 4, kind: input, shape index: {}]   ;;  %s402_s5 = inlined_call_operand.<no memory space> [shape: f32[1,1], index: 5, kind: input, shape index: {}]   ;;  %s403_s6 = inlined_call_operand.hbm [shape: f32[8,128], index: 6, kind: output, shape index: {0}]   ;;  %s404_s7 = inlined_call_operand.vmem [shape: f32[8,1], index: 7, kind: output, shape index: {1}]  }
   0x1   :  { %v13_v0 = vstv %s402_s5 }
   0x2   :  { %14 = vst [vmem:[#allocation2] sm:$0x1] %v13_v0 }
   0x3   :  { %v100_v1 = vld [vmem:[%s398_s1] sm:$0xff]  ;;  %v44_v3 = vld [vmem:[%s399_s2 + $0x70] sm:$0xff]  ;;  %v230_v4 = vmov 0   ;;  %v45_v5 = vld [vmem:[%s399_s2 + $0x78] sm:$0xff]  ;;  %vm58_vm0 = vcmask 261120  }
   0x4   :  { %198 = vset.pattern.permute.xlu0 %v230_v4  ;;  %v53_v7 = vpack.c.bf16 %v45_v5, %v44_v3  ;;  %v42_v8 = vld [vmem:[%s399_s2 + $0x60] sm:$0xff]  ;;  %v43_v9 = vld [vmem:[%s399_s2 + $0x68] sm:$0xff] }
   0x5   :  { %104 = vperm.xlu0 %198, %v100_v1  }
   0x6   :  { %v84_v10 = vsel %vm58_vm0, %v53_v7, 0 }
   0x9   :  { %v145_v2 = vld [vmem:[#allocation2] sm:$0x1] }
   0xa   :  { %v146_v6 = vmul.f32 0.5, %v145_v2 }
   0xb   :  { %15 = vsyncpa [#allocation4], 0  ;;  %86 = vmatpush.bf16.xpose.msra.mxu0 %v84_v10  ;;  %v52_v12 = vpack.c.bf16 %v43_v9, %v42_v8  ;;  %v40_v14 = vld [vmem:[%s399_s2 + $0x50] sm:$0xff]  ;;  %v41_v15 = vld [vmem:[%s399_s2 + $0x58] sm:$0xff]  ;;  %v101_v56 = vlaneseq  ;;  %v231_v59 = vmov 1.0   ;;  %v232_v4 = vmov 0.0  }
   0xc   :  { %v148_v11 = vperm.slane %v146_v6, 0  ;;  %v124_v16 = vld [vmem:[%s401_s4 + $0x78] sm:$0xff]  ;;  %v123_v17 = vld [vmem:[%s401_s4 + $0x70] sm:$0xff]  ;;  %v51_v18 = vpack.c.bf16 %v41_v15, %v40_v14  ;;  %v122_v19 = vld [vmem:[%s401_s4 + $0x68] sm:$0xff]  ;;  %s178_s21 = sshll.u32 %s403_s6, 4  ;;  %vm169_vm2 = vcmask 7168   ;;  %s179_s21 = int_to_ptr.hbm [resolvable:$true] %s178_s21 }
   0xd   :  { %v81_v13 = vsel %vm58_vm0, %v52_v12, 0  ;;  %125 = vmatpush.msra.mxu1 %v124_v16  ;;  %v121_v20 = vld [vmem:[%s401_s4 + $0x60] sm:$0xff]  ;;  %v39_v23 = vld [vmem:[%s399_s2 + $0x48] sm:$0xff]  ;;  %v120_v24 = vld [vmem:[%s401_s4 + $0x58] sm:$0xff]  ;;  %v102_v57 = vand.u32 127, %v101_v56 }
   0xe   :  { %150 = vperm.xlu0 %198, %v148_v11   ;;  %v78_v21 = vsel %vm58_vm0, %v51_v18, 0  ;;  %v38_v22 = vld [vmem:[%s399_s2 + $0x40] sm:$0xff]  ;;  %v119_v25 = vld [vmem:[%s401_s4 + $0x50] sm:$0xff]  ;;  %v118_v27 = vld [vmem:[%s401_s4 + $0x48] sm:$0xff] }
   0xf   :  { %126 = vmatpush.msra.mxu1 %v123_v17  ;;  %v50_v26 = vpack.c.bf16 %v39_v23, %v38_v22  ;;  %v117_v28 = vld [vmem:[%s401_s4 + $0x40] sm:$0xff]  ;;  %v36_v30 = vld [vmem:[%s399_s2 + $0x30] sm:$0xff]  ;;  %v37_v31 = vld [vmem:[%s399_s2 + $0x38] sm:$0xff] }
  0x10   :  { %v116_v32 = vld [vmem:[%s401_s4 + $0x38] sm:$0xff]  ;;  %v115_v33 = vld [vmem:[%s401_s4 + $0x30] sm:$0xff]  ;;  %v49_v34 = vpack.c.bf16 %v37_v31, %v36_v30  ;;  %v114_v35 = vld [vmem:[%s401_s4 + $0x28] sm:$0xff] }
  0x11   :  { %127 = vmatpush.msra.mxu1 %v122_v19  ;;  %v75_v29 = vsel %vm58_vm0, %v50_v26, 0  ;;  %v113_v36 = vld [vmem:[%s401_s4 + $0x20] sm:$0xff]  ;;  %v35_v39 = vld [vmem:[%s399_s2 + $0x28] sm:$0xff]  ;;  %v112_v40 = vld [vmem:[%s401_s4 + $0x18] sm:$0xff] }
  0x12   :  { %v72_v37 = vsel %vm58_vm0, %v49_v34, 0  ;;  %v34_v38 = vld [vmem:[%s399_s2 + $0x20] sm:$0xff]  ;;  %v111_v41 = vld [vmem:[%s401_s4 + $0x10] sm:$0xff]  ;;  %v110_v43 = vld [vmem:[%s401_s4 + $0x8] sm:$0xff] }
  0x13   :  { %87 = vmatpush.bf16.xpose.msra.mxu0 %v81_v13  ;;  %128 = vmatpush.msra.mxu1 %v121_v20  ;;  %v48_v42 = vpack.c.bf16 %v35_v39, %v34_v38  ;;  %v32_v45 = vld [vmem:[%s399_s2 + $0x10] sm:$0xff]  ;;  %v33_v46 = vld [vmem:[%s399_s2 + $0x18] sm:$0xff]  ;;  %v30_v49 = vld [vmem:[%s399_s2] sm:$0xff] }
  0x14   :  { %v47_v47 = vpack.c.bf16 %v33_v46, %v32_v45  ;;  %v31_v50 = vld [vmem:[%s399_s2 + $0x8] sm:$0xff]  ;;  %v28_v53 = vld [vmem:[%s397_s0] sm:$0xff]  ;;  %s233_s0 = smov [#allocation3]  }
  0x15   :  { %129 = vmatpush.msra.mxu1 %v120_v24  ;;  %v69_v44 = vsel %vm58_vm0, %v48_v42, 0  ;;  %v46_v51 = vpack.c.bf16 %v31_v50, %v30_v49  ;;  %v29_v54 = vpack.c.bf16 %v28_v53, %v28_v53  ;;  %v109_v55 = vld [vmem:[%s401_s4] sm:$0xff] }
  0x16   :  { %v66_v48 = vsel %vm58_vm0, %v47_v47, 0  ;;  %v199_v60 = vld [vmem:[%s400_s3] ss:$0 sm:$0xff]  ;;  %s176_s3 = sshll.u32 %s233_s0, 4  ;;  %s177_s3 = int_to_ptr.vmem [resolvable:$true] %s176_s3 }
  0x17   :  { %130 = vmatpush.msra.mxu1 %v119_v25  ;;  %v63_v52 = vsel %vm58_vm0, %v46_v51, 0 }
  0x19   :  { %131 = vmatpush.msra.mxu1 %v118_v27 }
  0x1b   :  { %88 = vmatpush.bf16.xpose.msra.mxu0 %v78_v21  ;;  %132 = vmatpush.msra.mxu1 %v117_v28 }
  0x1d   :  { %133 = vmatpush.msra.mxu1 %v116_v32 }
  0x1f   :  { %134 = vmatpush.msra.mxu1 %v115_v33 }
  0x21   :  { %135 = vmatpush.msra.mxu1 %v114_v35 }
  0x23   :  { %89 = vmatpush.bf16.xpose.msra.mxu0 %v75_v29  ;;  %136 = vmatpush.msra.mxu1 %v113_v36 }
  0x25   :  { %137 = vmatpush.msra.mxu1 %v112_v40 }
  0x27   :  { %138 = vmatpush.msra.mxu1 %v111_v41 }
  0x29   :  { %139 = vmatpush.msra.mxu1 %v110_v43 }
  0x2b   :  { %90 = vmatpush.bf16.xpose.msra.mxu0 %v72_v37  ;;  %140 = vmatpush.msra.mxu1 %v109_v55 }
  0x33   :  { %91 = vmatpush.bf16.xpose.msra.mxu0 %v69_v44 }
  0x3b   :  { %92 = vmatpush.bf16.xpose.msra.mxu0 %v66_v48 }
  0x43   :  { %93 = vmatpush.bf16.xpose.msra.mxu0 %v63_v52 }
  0x4a   :  { %191 = vmatmul.msk.bf16.vlgmr.msra.gmra.mxu0 %vm58_vm0, %v29_v54 }
  0x77   :  { %v105_v58 = vpop.permute.xlu0 %104 }
  0x78   :  { %vm106_vm1 = vcmp.eq.s32.totalorder %v102_v57, %v105_v58 }
  0x79   :  { %193 = vmatmul.msk.f32.vlgmr.msra.gmra.mxu1 %vm106_vm1, %v231_v59  ;;  %v192_v5 = vsel %vm106_vm1, 1.0, %v232_v4 }
  0x80   :  { %v151_v0 = vpop.permute.xlu0 %150 }
  0xc7   :  { %v95_v61 = vpop.f32.mrf.mxu0 }
  0xc8   :  { %v96_v62 = vadd.f32 %v199_v60, %v95_v61 }
  0xca   :  { %99 = vst [vmem:[#allocation3] sm:$0xff] %v96_v62 }
  0xcb   :  { %181 = dma.vmem_to_hbm [thread:$0]  %s177_s3, 128, %s179_s21, [#allocation4]  }
  0xcf   :  { %v97_v63 = vpop.f32.mrf.mxu0 }
  0xf6   :  { %v142_v1 = vpop.f32.mrf.mxu1 }
  0xf7   :  { %v153_v2 = vmul.f32 %v151_v0, %v142_v1 }
  0xf9   :  { %v154_v3 = vadd.f32 %v153_v2, %v96_v62 }
  0xfb   :  { %155 = vmax.xlane.f32.xlu1 %v154_v3  ;;  %v165_v6 = vmul.f32 %v192_v5, %v154_v3 }
  0xfd   :  { %166 = vadd.xlane.f32.xlu2 %v165_v6 }
 0x16e   :  { %v156_v7 = vpop.xlane.xlu1 %155 }
 0x16f   :  { %v157_v8 = vsub.f32 %v154_v3, %v156_v7 }
 0x170   :  { %v167_v15 = vpop.xlane.xlu2 %166 }
 0x171   :  { %v158_v9 = vmul.f32 1.442695, %v157_v8 }
 0x173   :  { %200 = vpow2.f32 %v158_v9 }
 0x179   :  { %v201_v10 = vpop.eup %200 }
 0x17a   :  { %160 = vadd.xlane.f32.xlu1 %v201_v10 }
 0x1ed   :  { %v161_v11 = vpop.xlane.xlu1 %160 }
 0x1ee   :  { %202 = vlog2.f32 %v161_v11 }
 0x1f4   :  { %v203_v12 = vpop.eup %202 }
 0x1f5   :  { %v163_v13 = vmul.f32 0.6931472, %v203_v12 }
 0x1f7   :  { %v164_v14 = vadd.f32 %v163_v13, %v156_v7 }
 0x1f9   :  { %v168_v16 = vsub.f32 %v164_v14, %v167_v15 }
 0x1fb   :  { %170 = vst.msk [vmem:[%s404_s7] sm:$0xff] %vm169_vm2, %v168_v16 }
 0x1fc   :  { %228 = dma.done.wait [#allocation4], 128  }
 0x1fd   :  { %229 = vsyncadd [#allocation4], 4294967168 }
 0x1fe   :  { %190 = vsyncpa [#allocation4], 1 }

// kernel: isda_loss_forward.4
= control target key start
LH: loop header
LB: loop body
LE: loop exit
PB: predicated region body
PF: predicated region fallthrough
CT: control target
= control target key end

     0   :  { %15 = vsyncpa [#allocation3], 0  ;;  %s2572_s0 = inlined_call_operand.vmem [shape: f32[8,32], index: 0, kind: input, shape index: {}]   ;;  %s2573_s1 = inlined_call_operand.vmem [shape: s32[8,1], index: 1, kind: input, shape index: {}]   ;;  %s2574_s2 = inlined_call_operand.vmem [shape: f32[10,1,32], index: 2, kind: input, shape index: {}]   ;;  %s2575_s3 = inlined_call_operand.vmem [shape: f32[10,1,1], index: 3, kind: input, shape index: {}]   ;;  %s2576_s4 = inlined_call_operand.vmem [shape: f32[10,32,32], index: 4, kind: input, shape index: {}]   ;;  %s2577_s5 = inlined_call_operand.vmem [shape: f32[128,32], index: 5, kind: input, shape index: {}]   ;;  %s2578_s6 = inlined_call_operand.hbm [shape: f32[10,32,32], index: 6, kind: output, shape index: {0}]   ;;  %s2579_s7 = inlined_call_operand.vmem [shape: f32[10,1,32], index: 7, kind: output, shape index: {1}]   ;;  %s2580_s8 = inlined_call_operand.vmem [shape: f32[10,1,1], index: 8, kind: output, shape index: {2}]   ;;  %s2581_s9 = inlined_call_operand.vmem [shape: f32[10,128,1], index: 9, kind: output, shape index: {3}]  }
   0x1   :  { %17 = vsyncpa [#allocation3 + $0x1], 0  ;;  %s1920_s30 = smov 0   ;;  %s1922_s10 = smov 0  }
   0x2   :  { %s1924_s11 = smov 0   ;;  %s1926_s12 = smov 0  }
   0x3 LB: > { %s1941_s13 = sadd.s32 4294967295, %s1864_s12   ;;  %s1618_s14 = sadd.s32 4294967294, %s1864_s12   ;;  %s1864_s12 = sphi %s1926_s12, %s2587_s12   ;;  %s1860_s11 = sphi %s1924_s11, %s2586_s11   ;;  %s1856_s10 = sphi %s1922_s10, %s2585_s10   ;;  %s1852_s30 = sphi %s1920_s30, %s2584_s30  }
   0x4   : > { %s1945_s15 = sadd.s32 1, %s1864_s12   ;;  %s171_s16 = sadd.s32 1, %s1860_s11 }
   0x5   : > { %s168_s17 = ssub.s32 %s1864_s12, %s1945_s15  ;;  %p181_p0 = scmp.ne.s32.totalorder %s1860_s11, %s1856_s10 }
   0x6   : > { %p169_p1 = scmp.eq.s32.totalorder %s168_s17, 0  ;;  %p182_p2 = scmp.eq.s32.totalorder %s1941_s13, 4 }
   0x7   : > { %p187_p3 = scmp.ne.s32.totalorder %s1856_s10, %s1852_s30  ;;  %p188_p4 = scmp.eq.s32.totalorder %s1618_s14, 4 }
   0x8   : > { %s1956_s18 = scalar_select %p169_p1, %s1860_s11, %s171_s16  }
   0x9   : > { %p1958_p5 = por %p182_p2, %p181_p0  ;;  %p1962_p6 = por %p188_p4, %p187_p3 }
   0xa   : > { %p1621_p7 = scmp.ge.s32.totalorder %s1864_s12, 1  ;;  %p319_p8 = scmp.lt.s32.totalorder %s1864_s12, 6 }
   0xc   : > { %p320_p9 = pnand %p1621_p7, %p319_p8 }
   0xd   : > { %s1969_s21 = sshll.u32 (!%p320_p9), %s1941_s13, 1 }
   0xe   : > { %323 = sbr.rel (%p320_p9) target bundleno = 1050 (0x41a), region = 44  ;;  %s1981_s26 = scalar_lea.vmem (!%p320_p9), %s2577_s5, %s1969_s21 }
   0xf   : > { %s927_s27 = sadd.s32 (!%p320_p9), 1, %s1969_s21  ;;  %p379_p10 = scmp.lt.s32.totalorder (!%p320_p9), %s1969_s21, 9 }
  0x13   : > { %v415_v0 = vld [vmem:[%s2573_s1] sm:$0xff]  ;;  %v1866_v1 = vmov 0   ;;  %v432_v2 = vstv %s1969_s21  ;;  %vm436_vm0 = vcmask 7168   ;;  %v928_v3 = vstv %s927_s27  ;;  %s2589_s21 = smov (!%p379_p10, %s1969_s21), 9 }
  0x14   : > { %1789 = vset.pattern.permute.xlu0 %v1866_v1  ;;  %1790 = vset.pattern.permute.xlu2 %v1866_v1  ;;  %vm433_vm1 = vcmp.eq.s32.totalorder %v415_v0, %v432_v2  ;;  %v1867_v4 = vmov 0.0   ;;  %vm929_vm2 = vcmp.eq.s32.totalorder %v415_v0, %v928_v3  ;;  %v1995_v23 = vld [vmem:[%s2572_s0] sm:$0xff]  ;;  %vm451_vm3 = vcmask 261120   ;;  %s2009_s17 = scalar_lea.vmem %s2574_s2, %s2589_s21  ;;  %s386_s24 = scalar_lea.vmem %s2575_s3, %s2589_s21 }
  0x15   : > { %v1634_v5 = vsel %vm433_vm1, 1.0, %v1867_v4  ;;  %v1660_v7 = vsel %vm929_vm2, 1.0, %v1867_v4  ;;  %1034 = vmatpush.msra.mxu3 %v1995_v23  ;;  %541 = vmatpush.msra.mxu0 %v1995_v23  ;;  %v2014_v45 = vld [vmem:[%s2009_s17 + $0x1] sm:$0x1]  ;;  %vm625_vm12 = vcmask 1040384   ;;  %s404_s28 = scalar_lea.vmem %s2580_s8, %s2589_s21  ;;  %vm713_vm13 = vcmask 0   ;;  %s399_s16 = scalar_lea.vmem %s2579_s7, %s2589_s21 }
  0x16   : > { %v437_v6 = vsel %vm436_vm0, %v1634_v5, 0.0  ;;  %v932_v9 = vsel %vm436_vm0, %v1660_v7, 0.0 }
  0x17   : > { %v438_v8 = vrot.slane %v437_v6, 4  ;;  %v933_v10 = vrot.slane %v932_v9, 4 }
  0x19   : > { %v439_v11 = vadd.f32 %v438_v8, %v437_v6  ;;  %v934_v12 = vadd.f32 %v933_v10, %v932_v9  ;;  %v2031_v6 = vld [vmem:[%s2009_s17] sm:$0x1]  ;;  %s1722_s17 = sshll.u32 %s2589_s21, 5 }
  0x1a   : > { %s2099_s25 = scalar_lea.vmem %s2576_s4, %s1722_s17 }
  0x1b   : > { %v440_v13 = vrot.slane %v439_v11, 2  ;;  %v935_v14 = vrot.slane %v934_v12, 2 }
  0x1d   : > { %v441_v15 = vadd.f32 %v440_v13, %v439_v11  ;;  %v936_v16 = vadd.f32 %v935_v14, %v934_v12  ;;  %v1665_v11 = vld [vmem:[%s386_s24 + $0x1] sm:$0x1]  ;;  %v559_v13 = vld [vmem:[%s386_s24] sm:$0x1] }
  0x1f   : > { %v442_v17 = vrot.slane %v441_v15, 1  ;;  %v937_v18 = vrot.slane %v936_v16, 1 }
  0x21   : > { %v1986_v19 = vadd.f32 %v442_v17, %v441_v15  ;;  %v1988_v20 = vadd.f32 %v937_v18, %v936_v16 }
  0x23   : > { %v444_v21 = vmax.f32 %v1986_v19, 1.0  ;;  %v939_v22 = vmax.f32 %v1988_v20, 1.0  ;;  %v1054_v12 = vadd.f32 %v1665_v11, %v1988_v20  ;;  %v560_v14 = vadd.f32 %v559_v13, %v1986_v19  ;;  %v658_v13 = vld [vmem:[%s2099_s25] sm:$0xff] }
  0x25   : > { %461 = vperm.xlu0 %1789, %v444_v21   ;;  %955 = vperm.xlu2 %1790, %v939_v22   ;;  %1681 = vst.msk [vmem:[%s404_s28 + $0x1] sm:$0x1] %vm713_vm13, %v1054_v12  ;;  %vm1055_vm14 = vcmp.gt.f32.partialorder %v1054_v12, 0.0  ;;  %vm561_vm15 = vcmp.gt.f32.partialorder %v560_v14, 0.0 }
  0x26   : > { %714 = vst.msk [vmem:[%s404_s28] sm:$0x1] %vm713_vm13, %v560_v14  ;;  %v1056_v15 = vsel %vm1055_vm14, %v1054_v12, 1.0  ;;  %v562_v16 = vsel %vm561_vm15, %v560_v14, 1.0  ;;  %s355_s28 = sand.u32 1, %s1856_s10  }
  0x27   : > { %vm1062_vm1 = vweird.f32 %v1056_v15  ;;  %s1622_s14 = sshll.u32 %s355_s28, 6 }
  0x2d   : > { %447 = vperm.xlu0 %1789, %v1634_v5   ;;  %942 = vperm.xlu2 %1790, %v1660_v7  }
  0x7f   : > { %v956_v24 = vpop.permute.xlu2 %955 }
  0x80   : > { %1794 = vrcp.f32 %v956_v24  ;;  %vm963_vm4 = vweird.f32 %v956_v24  ;;  %v969_v33 = vand.u32 2147483648, %v956_v24  ;;  %v967_v35 = vand.u32 2147483647, %v956_v24 }
  0x82   : > { %v970_v38 = vor.u32 1.1754944e-38, %v969_v33  ;;  %vm968_vm7 = vcmp.eq.f32.partialorder %v967_v35, 8.507059e+37  ;;  %v572_v35 = vand.u32 2147483647, %v562_v16 }
  0x86   : > { %v1795_v25 = vpop.eup %1794 }
  0x87   : > { %v959_v26 = vmul.f32 %v1795_v25, %v956_v24  ;;  %v943_v27 = vpop.permute.xlu2 %942  ;;  %vm964_vm5 = vweird.f32 %v1795_v25 }
  0x88   : > { %v945_v28 = vmul.f32 %v943_v27, %v1995_v23  ;;  %vm965_vm6 = vmor %vm963_vm4, %vm964_vm5 }
  0x89   : > { %v960_v29 = vsub.f32 1.0, %v959_v26 }
  0x8a   : > { %v946_v30 = vsel %vm451_vm3, %v945_v28, 0.0  ;;  %v1066_v28 = vand.u32 2147483647, %v1056_v15 }
  0x8b   : > { %v961_v31 = vmul.f32 %v1795_v25, %v960_v29  ;;  %v947_v32 = vrot.slane %v946_v30, 4 }
  0x8c   : > { %vm1067_vm5 = vcmp.eq.f32.partialorder %v1066_v28, 8.507059e+37 }
  0x8d   : > { %v962_v34 = vadd.f32 %v1795_v25, %v961_v31  ;;  %v948_v36 = vadd.f32 %v947_v32, %v946_v30  ;;  %v574_v32 = vand.u32 2147483648, %v562_v16 }
  0x8f   : > { %v949_v37 = vrot.slane %v948_v36, 2  ;;  %v966_v39 = vsel %vm965_vm6, %v1795_v25, %v962_v34  ;;  %v1068_v25 = vand.u32 2147483648, %v1056_v15  ;;  %vm568_vm6 = vweird.f32 %v562_v16 }
  0x90   : > { %v2011_v42 = vsel %vm968_vm7, %v970_v38, %v966_v39 }
  0x91   : > { %v950_v40 = vadd.f32 %v949_v37, %v948_v36  ;;  %v1069_v29 = vor.u32 1.1754944e-38, %v1068_v25  ;;  %v575_v37 = vor.u32 1.1754944e-38, %v574_v32 }
  0x93   : > { %v951_v41 = vrot.slane %v950_v40, 1 }
  0x95   : > { %v952_v43 = vadd.f32 %v951_v41, %v950_v40 }
  0x97   : > { %v462_v44 = vpop.permute.xlu0 %461  ;;  %v2017_v46 = vmul.f32 %v2011_v42, %v952_v43 }
  0x98   : > { %1796 = vrcp.f32 %v462_v44  ;;  %v475_v61 = vand.u32 2147483648, %v462_v44  ;;  %vm469_vm9 = vweird.f32 %v462_v44  ;;  %v473_v62 = vand.u32 2147483647, %v462_v44 }
  0x99   : > { %v973_v47 = vsub.f32 %v1995_v23, %v2017_v46  ;;  %v2023_v48 = vsub.f32 %v2014_v45, %v2017_v46  ;;  %1798 = vrcp.f32 %v1056_v15 }
  0x9a   : > { %v476_v3 = vor.u32 1.1754944e-38, %v475_v61  ;;  %vm474_vm11 = vcmp.eq.f32.partialorder %v473_v62, 8.507059e+37  ;;  %1800 = vrcp.f32 %v562_v16 }
  0x9b   : > { %v974_v49 = vmul.f32 %v973_v47, %v943_v27  ;;  %1076 = vxpose.xlu2.b32.start.end [1/1] (short) (narrow) %v2023_v48, 32 }
  0x9d   : > { %975 = vxpose.xlu0.b32.start.end [1/1] (short) (narrow) %v974_v49, 32 }
  0x9e   : > { %v1797_v50 = vpop.eup %1796 }
  0x9f   : > { %v465_v51 = vmul.f32 %v1797_v50, %v462_v44  ;;  %v448_v52 = vpop.permute.xlu0 %447  ;;  %vm470_vm8 = vweird.f32 %v1797_v50  ;;  %v1799_v17 = vpop.eup %1798 }
  0xa0   : > { %v450_v53 = vmul.f32 %v448_v52, %v1995_v23  ;;  %vm471_vm10 = vmor %vm469_vm9, %vm470_vm8  ;;  %v1058_v18 = vmul.f32 %v1799_v17, %v1056_v15  ;;  %v1801_v21 = vpop.eup %1800  ;;  %vm1063_vm2 = vweird.f32 %v1799_v17  ;;  %vm573_vm9 = vcmp.eq.f32.partialorder %v572_v35, 8.507059e+37 }
  0xa1   : > { %v466_v54 = vsub.f32 1.0, %v465_v51  ;;  %vm1064_vm4 = vmor %vm1062_vm1, %vm1063_vm2  ;;  %vm569_vm7 = vweird.f32 %v1801_v21 }
  0xa2   : > { %v452_v55 = vsel %vm451_vm3, %v450_v53, 0.0  ;;  %v1059_v22 = vsub.f32 1.0, %v1058_v18  ;;  %vm570_vm8 = vmor %vm568_vm6, %vm569_vm7 }
  0xa3   : > { %v467_v56 = vmul.f32 %v1797_v50, %v466_v54  ;;  %v453_v57 = vrot.slane %v452_v55, 4 }
  0xa4   : > { %v1060_v24 = vmul.f32 %v1799_v17, %v1059_v22 }
  0xa5   : > { %v454_v58 = vadd.f32 %v453_v57, %v452_v55  ;;  %v468_v59 = vadd.f32 %v1797_v50, %v467_v56 }
  0xa6   : > { %v1061_v27 = vadd.f32 %v1799_v17, %v1060_v24  ;;  %v659_v24 = vld [vmem:[%s2099_s25 + $0x8] sm:$0xff] }
  0xa7   : > { %v455_v60 = vrot.slane %v454_v58, 2  ;;  %v472_v0 = vsel %vm471_vm10, %v1797_v50, %v468_v59  ;;  %vm513_vm10 = vcmask 64512  }
  0xa8   : > { %v2028_v5 = vsel %vm474_vm11, %v476_v3, %v472_v0  ;;  %v1065_v31 = vsel %vm1064_vm4, %v1799_v17, %v1061_v27  ;;  %vm711_vm11 = vcmask 253952  }
  0xa9   : > { %v456_v63 = vadd.f32 %v455_v60, %v454_v58  ;;  %v1070_v33 = vsel %vm1067_vm5, %v1069_v29, %v1065_v31 }
  0xaa   : > { %v1071_v36 = vmul.f32 %v1070_v33, %v1988_v20  ;;  %v660_v33 = vld [vmem:[%s2099_s25 + $0x10] sm:$0xff] }
  0xab   : > { %v457_v2 = vrot.slane %v456_v63, 1 }
  0xac   : > { %v2055_v39 = vsel %vm1055_vm14, %v1071_v36, 0.0 }
  0xad   : > { %v458_v4 = vadd.f32 %v457_v2, %v456_v63  ;;  %v2064_v49 = vsub.f32 1.0, %v2055_v39 }
  0xaf   : > { %v2034_v7 = vmul.f32 %v2028_v5, %v458_v4 }
  0xb1   : > { %v580_v8 = vsub.f32 %v2031_v6, %v2034_v7  ;;  %v479_v9 = vsub.f32 %v1995_v23, %v2034_v7  ;;  %v564_v23 = vmul.f32 %v1801_v21, %v562_v16 }
  0xb3   : > { %1639 = vmatpush.msk.msra.mxu1 %vm625_vm12, %v580_v8  ;;  %v480_v10 = vmul.f32 %v479_v9, %v448_v52  ;;  %v565_v26 = vsub.f32 1.0, %v564_v23 }
  0xb5   : > { %481 = vxpose.xlu1.b32.start.end [1/1] (short) (narrow) %v480_v10, 32  ;;  %v566_v30 = vmul.f32 %v1801_v21, %v565_v26 }
  0xb7   : > { %v567_v34 = vadd.f32 %v1801_v21, %v566_v30 }
  0xb9   : > { %v571_v38 = vsel %vm570_vm8, %v1801_v21, %v567_v34 }
  0xba   : > { %v576_v40 = vsel %vm573_vm9, %v575_v37, %v571_v38 }
  0xbb   : > { %v577_v41 = vmul.f32 %v576_v40, %v1986_v19 }
  0xbd   : > { %v578_v43 = vsel %vm561_vm15, %v577_v41, 0.0 }
  0xbe   : > { %v662_v44 = vsub.f32 1.0, %v578_v43 }
  0xc0   : > { %1734 = vpush %v662_v44  ;;  %v683_v54 = vmul.f32 %v662_v44, %v578_v43 }
  0xc1   : > { %1736 = vpush %v578_v43 }
  0xc2   : > { %1738 = vpush %v683_v54  ;;  %v2133_v54 = vld [vmem:[%s2577_s5 + $0x20] sm:$0xff] }
  0xc3   : > { %1740 = vpush %v2064_v49 }
  0xc4   : > { %1742 = vpush %v2055_v39 }
  0xd5   : > { %581 = vxpose.xlu1.b32.start.end [1/1] (short) (narrow) %v580_v8, 32 }
  0xf1   : > { %s1735_s22 = spop %1734 }
  0xf2   : > { %s1737_s27 = spop %1736 }
  0xf3   : > { %v673_v14 = vstv %s1737_s27  ;;  %s1739_s29 = spop %1738 }
  0xf4   : > { %v686_v17 = vstv %s1739_s29  ;;  %s1741_s24 = spop %1740 }
  0xf5   : > { %s1743_s27 = spop %1742 }
 0x11c   : > { %1202 = vperm.xlu2 %1790, %v2055_v39  }
 0x123   : > { %706 = vperm.xlu0 %1789, %v578_v43  }
 0x128   : > { %1791 = vset.pattern.permute.xlu1 %v1866_v1 }
 0x134   : > { %v2079_v59 = vpop.trf.xlu2 }
 0x13c   : > { %v2081_v60 = vpop.trf.xlu2 }
 0x141   : > { %v991_v20 = vpop.trf.xlu0 }
 0x142   : > { %1661 = vmatmul.msk.f32.vlgmr.msra.gmra.mxu3 %vm513_vm10, %v991_v20 }
 0x144   : > { %v2083_v61 = vpop.trf.xlu2 }
 0x147   : > { %701 = vperm.xlu1 %1791, %v662_v44   ;;  %v661_v44 = vld [vmem:[%s2099_s25 + $0x18] sm:$0xff] }
 0x149   : > { %v992_v47 = vpop.trf.xlu0 }
 0x14a   : > { %1662 = vmatmul.msk.f32.gmra.mxu3 %vm513_vm10, %v992_v47 }
 0x14c   : > { %v2085_v62 = vpop.trf.xlu2 }
 0x14f   : > { %1197 = vperm.xlu1 %1791, %v2064_v49  }
 0x151   : > { %v993_v19 = vpop.trf.xlu0 }
 0x152   : > { %1663 = vmatmul.msk.f32.gmra.mxu3 %vm513_vm10, %v993_v19 }
 0x159   : > { %v497_v50 = vpop.trf.xlu1  ;;  %v994_v1 = vpop.trf.xlu0 }
 0x15a   : > { %1635 = vmatmul.msk.f32.vlgmr.msra.gmra.mxu0 %vm513_vm10, %v497_v50  ;;  %1664 = vmatmul.msk.f32.gmra.mxu3 %vm513_vm10, %v994_v1 }
 0x161   : > { %v498_v51 = vpop.trf.xlu1 }
 0x162   : > { %1636 = vmatmul.msk.f32.gmra.mxu0 %vm513_vm10, %v498_v51 }
 0x169   : > { %v499_v52 = vpop.trf.xlu1 }
 0x16a   : > { %1637 = vmatmul.msk.f32.gmra.mxu0 %vm513_vm10, %v499_v52 }
 0x171   : > { %v500_v53 = vpop.trf.xlu1 }
 0x172   : > { %1638 = vmatmul.msk.f32.gmra.mxu0 %vm513_vm10, %v500_v53  ;;  %v2121_v53 = vld [vmem:[%s1981_s26] ss:$0 sm:$0xff] }
 0x176   : > { %v1203_v8 = vpop.permute.xlu2 %1202 }
 0x177   : > { %v1205_v10 = vmul.f32 %v1203_v8, %v2017_v46  ;;  %v665_v46 = vstv %s1735_s22  ;;  %v1178_v8 = vmul.f32 %v2064_v49, %v2055_v39  ;;  %v2202_v39 = vld [vmem:[%s2577_s5 + $0x38] sm:$0xff] }
 0x178   : > { %v667_v15 = vmul.f32 %v665_v46, %v658_v13  ;;  %v668_v27 = vmul.f32 %v665_v46, %v659_v24  ;;  %v669_v35 = vmul.f32 %v665_v46, %v660_v33  ;;  %v670_v47 = vmul.f32 %v665_v46, %v661_v44  ;;  %v2249_v13 = vld [vmem:[%s2577_s5 + $0x58] sm:$0xff]  ;;  %v1672_v44 = vld [vmem:[%s2099_s25 + $0x20] sm:$0xff] }
 0x179   : > { %v597_v55 = vpop.trf.xlu1  ;;  %1744 = vpush %v1178_v8  ;;  %v2206_v49 = vsub.f32 %v2202_v39, %v2121_v53  ;;  %v2253_v46 = vsub.f32 %v2249_v13, %v2121_v53 }
 0x17a   : > { %1640 = vmatmul.msk.f32.vlgmr.msra.gmra.mxu1 %vm436_vm0, %v597_v55 }
 0x181   : > { %v598_v56 = vpop.trf.xlu1 }
 0x182   : > { %1641 = vmatmul.msk.f32.gmra.mxu1 %vm436_vm0, %v598_v56  ;;  %v722_v56 = vsub.f32 %v2133_v54, %v2121_v53 }
 0x189   : > { %v599_v57 = vpop.trf.xlu1 }
 0x18a   : > { %1642 = vmatmul.msk.f32.gmra.mxu1 %vm436_vm0, %v599_v57  ;;  %v2146_v57 = vld [vmem:[%s2577_s5 + $0x8] sm:$0xff] }
 0x191   : > { %v600_v58 = vpop.trf.xlu1 }
 0x192   : > { %1643 = vmatmul.msk.f32.gmra.mxu1 %vm436_vm0, %v600_v58  ;;  %v2151_v58 = vld [vmem:[%s2577_s5 + $0x28] sm:$0xff] }
 0x195   : > { %v707_v63 = vpop.permute.xlu0 %706 }
 0x196   : > { %v709_v2 = vmul.f32 %v707_v63, %v2034_v7  ;;  %v719_v63 = vsub.f32 %v2146_v57, %v2121_v53 }
 0x1b9   : > { %v702_v0 = vpop.permute.xlu1 %701 }
 0x1ba   : > { %v704_v3 = vmul.f32 %v702_v0, %v2031_v6  ;;  %v723_v0 = vsub.f32 %v2151_v58, %v2121_v53 }
 0x1bc   : > { %v710_v4 = vadd.f32 %v709_v2, %v704_v3  ;;  %v2170_v3 = vld [vmem:[%s2577_s5 + $0x18] sm:$0xff] }
 0x1be   : > { %712 = vst.msk [vmem:[%s399_s16] sm:$0x1] %vm711_vm11, %v710_v4  ;;  %v2174_v4 = vsub.f32 %v2170_v3, %v2121_v53 }
 0x1c1   : > { %v1198_v9 = vpop.permute.xlu1 %1197 }
 0x1c2   : > { %v1200_v11 = vmul.f32 %v2014_v45, %v1198_v9  ;;  %v2183_v9 = vld [vmem:[%s2577_s5 + $0x30] sm:$0xff] }
 0x1c4   : > { %v1206_v12 = vadd.f32 %v1205_v10, %v1200_v11  ;;  %v2187_v10 = vsub.f32 %v2183_v9, %v2121_v53  ;;  %v2232_v11 = vld [vmem:[%s2577_s5 + $0x50] sm:$0xff] }
 0x1c6   : > { %1680 = vst.msk [vmem:[%s399_s16 + $0x1] sm:$0x1] %vm711_vm11, %v1206_v12  ;;  %s2108_s16 = scalar_lea.vmem [#allocation2], %s1622_s14  ;;  %v2236_v12 = vsub.f32 %v2232_v11, %v2121_v53 }
 0x1d7   : > { %v543_v7 = vpop.f32.mrf.mxu0 }
 0x1d8   : > { %v555_v6 = vmul.f32 %v543_v7, %v2028_v5  ;;  %v2241_v7 = vld [vmem:[%s1981_s26 + $0x1] ss:$0 sm:$0xff]  ;;  %s1745_s26 = spop %1744 }
 0x1da   : > { %v675_v16 = vmul.f32 %v673_v14, %v555_v6 }
 0x1dc   : > { %v679_v22 = vadd.f32 %v675_v16, %v667_v15 }
 0x1df   : > { %v546_v45 = vpop.f32.mrf.mxu0 }
 0x1e0   : > { %v556_v21 = vmul.f32 %v546_v45, %v2028_v5 }
 0x1e2   : > { %v676_v28 = vmul.f32 %v673_v14, %v556_v21 }
 0x1e4   : > { %v680_v31 = vadd.f32 %v676_v28, %v668_v27 }
 0x1e7   : > { %v549_v26 = vpop.f32.mrf.mxu0 }
 0x1e8   : > { %v557_v30 = vmul.f32 %v549_v26, %v2028_v5  ;;  %v2284_v26 = vld [vmem:[%s2577_s5 + $0x70] sm:$0xff] }
 0x1e9   : > { %v2288_v28 = vsub.f32 %v2284_v26, %v2121_v53 }
 0x1ea   : > { %v677_v36 = vmul.f32 %v673_v14, %v557_v30 }
 0x1ec   : > { %v681_v41 = vadd.f32 %v677_v36, %v669_v35 }
 0x1ef   : > { %v552_v37 = vpop.f32.mrf.mxu0 }
 0x1f0   : > { %v558_v40 = vmul.f32 %v552_v37, %v2028_v5  ;;  %v2128_v5 = vld [vmem:[%s2577_s5] sm:$0xff]  ;;  %v2298_v37 = vld [vmem:[%s2577_s5 + $0x78] sm:$0xff] }
 0x1f1   : > { %v718_v55 = vsub.f32 %v2128_v5, %v2121_v53 }
 0x1f2   : > { %v678_v19 = vmul.f32 %v673_v14, %v558_v40  ;;  %v2260_v14 = vld [vmem:[%s2577_s5 + $0x60] sm:$0xff] }
 0x1f3   : > { %v2264_v45 = vsub.f32 %v2260_v14, %v2121_v53 }
 0x1f4   : > { %v682_v1 = vadd.f32 %v678_v19, %v670_v47  ;;  %v1168_v47 = vstv %s1743_s27  ;;  %s1452_s27 = sshll.u32 %s2108_s16, 4  ;;  %s1453_s27 = int_to_ptr.vmem [resolvable:$true] %s1452_s27 }
 0x1f7   : > { %v646_v18 = vpop.f32.mrf.mxu1 }
 0x1f8   : > { %v688_v23 = vmul.f32 %v686_v17, %v646_v18  ;;  %v2272_v18 = vld [vmem:[%s2577_s5 + $0x68] sm:$0xff] }
 0x1f9   : > { %v2276_v21 = vsub.f32 %v2272_v18, %v2121_v53 }
 0x1fa   : > { %v692_v25 = vadd.f32 %v688_v23, %v679_v22 }
 0x1fc   : > { %696 = vst.msk [vmem:[%s2108_s16] sm:$0xff] %vm451_vm3, %v692_v25 }
 0x1ff   : > { %v649_v29 = vpop.f32.mrf.mxu1 }
 0x200   : > { %v689_v32 = vmul.f32 %v686_v17, %v649_v29 }
 0x202   : > { %v693_v34 = vadd.f32 %v689_v32, %v680_v31  ;;  %v1036_v31 = vpop.f32.mrf.mxu3 }
 0x204   : > { %697 = vst.msk [vmem:[%s2108_s16 + $0x8] sm:$0xff] %vm451_vm3, %v693_v34 }
 0x207   : > { %v652_v38 = vpop.f32.mrf.mxu1 }
 0x208   : > { %v690_v43 = vmul.f32 %v686_v17, %v652_v38  ;;  %v2302_v38 = vsub.f32 %v2298_v37, %v2121_v53 }
 0x20a   : > { %v694_v20 = vadd.f32 %v690_v43, %v681_v41  ;;  %v1048_v41 = vmul.f32 %v1036_v31, %v2011_v42  ;;  %v1039_v19 = vpop.f32.mrf.mxu3 }
 0x20c   : > { %698 = vst.msk [vmem:[%s2108_s16 + $0x10] sm:$0xff] %vm451_vm3, %v694_v20 }
 0x20f   : > { %v655_v50 = vpop.f32.mrf.mxu1 }
 0x210   : > { %v691_v51 = vmul.f32 %v686_v17, %v655_v50 }
 0x212   : > { %v695_v52 = vadd.f32 %v691_v51, %v682_v1  ;;  %v1170_v51 = vmul.f32 %v1168_v47, %v1048_v41 }
 0x214   : > { %699 = vst.msk [vmem:[%s2108_s16 + $0x18] sm:$0xff] %vm451_vm3, %v695_v52  ;;  %794 = vmatpush.msrb.mxu0 %v695_v52  ;;  %1726 = vmatpush.msra.mxu2 %v695_v52  ;;  %v1181_v52 = vstv %s1745_s26 }
 0x216   : > { %795 = vmatpush.msrb.mxu0 %v694_v20  ;;  %1727 = vmatpush.msra.mxu2 %v694_v20  ;;  %v1160_v20 = vstv %s1741_s24 }
 0x217   : > { %v1162_v1 = vmul.f32 %v1672_v44, %v1160_v20 }
 0x218   : > { %796 = vmatpush.msrb.mxu0 %v693_v34  ;;  %1728 = vmatpush.msra.mxu2 %v693_v34 }
 0x21a   : > { %797 = vmatpush.msrb.mxu0 %v692_v25  ;;  %1729 = vmatpush.msra.mxu2 %v692_v25 }
 0x21b   : > { %1644 = vmatmul.msk.f32.vlgmr.msrb.gmra.mxu0 %vm451_vm3, %v718_v55  ;;  %1648 = vmatmul.msk.f32.vlgmr.msra.gmra.mxu2 %vm451_vm3, %v722_v56 }
 0x21c   : > { %1667 = vmatpush.msk.msra.mxu0 %vm625_vm12, %v2023_v48  ;;  %v2162_v48 = vld [vmem:[%s2577_s5 + $0x10] sm:$0xff] }
 0x21d   : > { %v720_v2 = vsub.f32 %v2162_v48, %v2121_v53 }
 0x223   : > { %1645 = vmatmul.msk.f32.gmra.mxu0 %vm451_vm3, %v719_v63  ;;  %1649 = vmatmul.msk.f32.gmra.mxu2 %vm451_vm3, %v723_v0 }
 0x22b   : > { %1646 = vmatmul.msk.f32.gmra.mxu0 %vm451_vm3, %v720_v2  ;;  %1650 = vmatmul.msk.f32.gmra.mxu2 %vm451_vm3, %v2187_v10 }
 0x233   : > { %1647 = vmatmul.msk.f32.gmra.mxu0 %vm451_vm3, %v2174_v4  ;;  %1651 = vmatmul.msk.f32.gmra.mxu2 %vm451_vm3, %v2206_v49 }
 0x23b   : > { %1668 = vmatmul.msk.f32.vlgmr.msra.gmra.mxu0 %vm436_vm0, %v2079_v59  ;;  %v2213_v59 = vld [vmem:[%s2577_s5 + $0x40] sm:$0xff] }
 0x243   : > { %1669 = vmatmul.msk.f32.gmra.mxu0 %vm436_vm0, %v2081_v60  ;;  %v2217_v60 = vsub.f32 %v2213_v59, %v2121_v53 }
 0x245   : > { %1652 = vmatmul.msk.f32.gmra.mxu2 %vm451_vm3, %v2217_v60 }
 0x24b   : > { %1670 = vmatmul.msk.f32.gmra.mxu0 %vm436_vm0, %v2083_v61  ;;  %v425_v61 = vld [vmem:[%s2577_s5 + $0x48] sm:$0xff] }
 0x24c   : > { %v2244_v6 = vsub.f32 %v425_v61, %v2241_v7 }
 0x253   : > { %1671 = vmatmul.msk.f32.gmra.mxu0 %vm436_vm0, %v2085_v62  ;;  %v2225_v62 = vsub.f32 %v425_v61, %v2121_v53 }
 0x255   : > { %1653 = vmatmul.msk.f32.gmra.mxu2 %vm451_vm3, %v2225_v62 }
 0x25d   : > { %1654 = vmatmul.msk.f32.gmra.mxu2 %vm451_vm3, %v2236_v12 }
 0x265   : > { %1655 = vmatmul.msk.f32.gmra.mxu2 %vm451_vm3, %v2253_v46 }
 0x26d   : > { %1656 = vmatmul.msk.f32.gmra.mxu2 %vm451_vm3, %v2264_v45 }
 0x275   : > { %1657 = vmatmul.msk.f32.gmra.mxu2 %vm451_vm3, %v2276_v21 }
 0x27d   : > { %1658 = vmatmul.msk.f32.gmra.mxu2 %vm451_vm3, %v2288_v28 }
 0x285   : > { %1659 = vmatmul.msk.f32.gmra.mxu2 %vm451_vm3, %v2302_v38 }
 0x298   : > { %v799_v15 = vpop.f32.mrf.mxu0 }
 0x299   : > { %v847_v16 = vmul.f32 %v799_v15, %v718_v55  ;;  %v1049_v55 = vmul.f32 %v1039_v19, %v2011_v42 }
 0x29b   : > { %v863_v17 = vsel %vm451_vm3, %v847_v16, 0.0  ;;  %v1171_v61 = vmul.f32 %v1168_v47, %v1049_v55 }
 0x29c   : > { %864 = vadd.xlane.f32.xlu2 %v863_v17 }
 0x29e   : > { %v811_v22 = vpop.f32.mrf.mxu2 }
 0x29f   : > { %v851_v23 = vmul.f32 %v811_v22, %v722_v56  ;;  %v1174_v56 = vadd.f32 %v1170_v51, %v1162_v1  ;;  %v2364_v1 = vsub.f32 %v2170_v3, %v2241_v7  ;;  %v2378_v3 = vsub.f32 %v2272_v18, %v2241_v7 }
 0x2a0   : > { %v802_v24 = vpop.f32.mrf.mxu0  ;;  %v2392_v18 = vsub.f32 %v2284_v26, %v2241_v7  ;;  %v2406_v26 = vsub.f32 %v2298_v37, %v2241_v7 }
 0x2a1   : > { %v875_v25 = vsel %vm451_vm3, %v851_v23, 0.0  ;;  %v848_v27 = vmul.f32 %v802_v24, %v719_v63  ;;  %v1674_v23 = vld [vmem:[%s2099_s25 + $0x30] sm:$0xff] }
 0x2a2   : > { %876 = vadd.xlane.f32.xlu1 %v875_v25  ;;  %v2318_v25 = vsub.f32 %v2232_v11, %v2241_v7 }
 0x2a3   : > { %v866_v34 = vsel %vm451_vm3, %v848_v27, 0.0  ;;  %v1164_v27 = vmul.f32 %v1674_v23, %v1160_v20 }
 0x2a6   : > { %v814_v29 = vpop.f32.mrf.mxu2 }
 0x2a7   : > { %v852_v30 = vmul.f32 %v814_v29, %v723_v0  ;;  %v1673_v0 = vld [vmem:[%s2099_s25 + $0x28] sm:$0xff] }
 0x2a8   : > { %v805_v32 = vpop.f32.mrf.mxu0  ;;  %v1163_v8 = vmul.f32 %v1673_v0, %v1160_v20 }
 0x2a9   : > { %v849_v33 = vmul.f32 %v805_v32, %v720_v2  ;;  %v878_v35 = vsel %vm451_vm3, %v852_v30, 0.0 }
 0x2aa   : > { %867 = vadd.xlane.f32.xlu1 %v866_v34  ;;  %879 = vadd.xlane.f32.xlu2 %v878_v35  ;;  %v1175_v17 = vadd.f32 %v1171_v61, %v1163_v8  ;;  %v1675_v35 = vld [vmem:[%s2099_s25 + $0x38] sm:$0xff]  ;;  %s1723_s25 = sshll.u32 %s2589_s21, 7  ;;  %s1725_s21 = sshll.u32 %s1941_s13, 6 }
 0x2ab   : > { %v869_v36 = vsel %vm451_vm3, %v849_v33, 0.0  ;;  %v1165_v41 = vmul.f32 %v1675_v35, %v1160_v20  ;;  %s2417_s17 = scalar_lea.vmem %s2581_s9, %s1723_s25  ;;  %s1451_s24 = scalar_lea.hbm %s2578_s6, %s1725_s21 }
 0x2ac   : > { %870 = vadd.xlane.f32.xlu0 %v869_v36  ;;  %s1454_s26 = sshll.u32 %s1451_s24, 4  ;;  %s1425_s25 = scalar_lea.sflag [#allocation3], %s355_s28  ;;  %s1455_s26 = int_to_ptr.hbm [resolvable:$true] %s1454_s26 }
 0x2ad   : > { %s1816_s29 = sshra.s32 %s1455_s26, 4  ;;  %s1822_s21 = scalar_lea.hbm %s2578_s6, 320  ;;  %s1817_s29 = int_to_ptr.hbm [resolvable:$true] %s1816_s29 }
 0x2ae   : > { %v817_v20 = vpop.f32.mrf.mxu2  ;;  %s1818_s13 = scalar_lea.hbm %s1817_s29, 64  ;;  %p1823_p0 = scmp.lt.s32.totalorder %s1817_s29, %s2578_s6 }
 0x2af   : > { %p1819_p11 = scmp.ne.s32.totalorder %s1817_s29, %s1818_s13  ;;  %p1824_p1 = scmp.lt.s32.totalorder %s1822_s21, %s1818_s13 }
 0x2b0   : > { %v808_v40 = vpop.f32.mrf.mxu0 }
 0x2b1   : > { %v850_v43 = vmul.f32 %v808_v40, %v2174_v4  ;;  %v1042_v4 = vpop.f32.mrf.mxu3  ;;  %v2326_v40 = vsub.f32 %v2249_v13, %v2241_v7  ;;  %v2338_v13 = vsub.f32 %v2128_v5, %v2241_v7  ;;  %v2354_v5 = vsub.f32 %v2162_v48, %v2241_v7  ;;  %p1820_p12 = pnand %p1819_p11, %p1958_p5  ;;  %p1825_p2 = por %p1824_p1, %p1823_p0 }
 0x2b2   : > { %v1050_v16 = vmul.f32 %v1042_v4, %v2011_v42 }
 0x2b3   : > { %v872_v50 = vsel %vm451_vm3, %v850_v43, 0.0  ;;  %p1821_p13 = pneg %p1820_p12 }
 0x2b4   : > { %873 = vadd.xlane.f32.xlu2 %v872_v50  ;;  %v1172_v29 = vmul.f32 %v1168_v47, %v1050_v16 }
 0x2b5   : > { %p1826_p3 = pnand %p1825_p2, %p1821_p13 }
 0x2b6   : > { %v1176_v33 = vadd.f32 %v1172_v29, %v1164_v27  ;;  %v820_v51 = vpop.f32.mrf.mxu2 }
 0x2b7   : > { %v854_v48 = vmul.f32 %v820_v51, %v2206_v49 }
 0x2b8   : > { %v1140_v53 = vpop.f32.mrf.mxu0 }
 0x2b9   : > { %v1183_v63 = vmul.f32 %v1181_v52, %v1140_v53  ;;  %v1045_v30 = vpop.f32.mrf.mxu3 }
 0x2ba   : > { %v1051_v32 = vmul.f32 %v1045_v30, %v2011_v42  ;;  %v2334_v42 = vsub.f32 %v2260_v14, %v2241_v7  ;;  %v2346_v14 = vsub.f32 %v2146_v57, %v2241_v7 }
 0x2bb   : > { %v1187_v2 = vadd.f32 %v1183_v63, %v1174_v56 }
 0x2bc   : > { %v1173_v11 = vmul.f32 %v1168_v47, %v1051_v32  ;;  %v853_v47 = vmul.f32 %v817_v20, %v2187_v10  ;;  %v884_v10 = vsel %vm451_vm3, %v854_v48, 0.0 }
 0x2bd   : > { %1676 = vst.msk [vmem:[%s2108_s16 + $0x20] sm:$0xff] %vm451_vm3, %v1187_v2  ;;  %885 = vadd.xlane.f32.xlu2 %v884_v10 }
 0x2be   : > { %v1177_v44 = vadd.f32 %v1173_v11, %v1165_v41  ;;  %v881_v57 = vsel %vm451_vm3, %v853_v47, 0.0 }
 0x2bf   : > { %882 = vadd.xlane.f32.xlu1 %v881_v57 }
 0x2c0   : > { %v1143_v15 = vpop.f32.mrf.mxu0 }
 0x2c1   : > { %v1184_v22 = vmul.f32 %v1181_v52, %v1143_v15  ;;  %v2434_v15 = vsub.f32 %v2213_v59, %v2241_v7 }
 0x2c3   : > { %v1188_v24 = vadd.f32 %v1184_v22, %v1175_v17 }
 0x2c5   : > { %1677 = vst.msk [vmem:[%s2108_s16 + $0x28] sm:$0xff] %vm451_vm3, %v1188_v24 }
 0x2c8   : > { %v1146_v31 = vpop.f32.mrf.mxu0  ;;  %v823_v53 = vpop.f32.mrf.mxu2 }
 0x2c9   : > { %v1185_v34 = vmul.f32 %v1181_v52, %v1146_v31  ;;  %v855_v49 = vmul.f32 %v823_v53, %v2217_v60 }
 0x2cb   : > { %v1189_v36 = vadd.f32 %v1185_v34, %v1176_v33  ;;  %v887_v55 = vsel %vm451_vm3, %v855_v49, 0.0 }
 0x2cc   : > { %888 = vadd.xlane.f32.xlu1 %v887_v55 }
 0x2cd   : > { %1678 = vst.msk [vmem:[%s2108_s16 + $0x30] sm:$0xff] %vm451_vm3, %v1189_v36 }
 0x2d0   : > { %v1149_v43 = vpop.f32.mrf.mxu0 }
 0x2d1   : > { %v1186_v19 = vmul.f32 %v1181_v52, %v1149_v43  ;;  %v2374_v52 = vsub.f32 %v2133_v54, %v2241_v7  ;;  %v2388_v54 = vsub.f32 %v2151_v58, %v2241_v7  ;;  %v2402_v58 = vsub.f32 %v2183_v9, %v2241_v7 }
 0x2d3   : > { %v1190_v50 = vadd.f32 %v1186_v19, %v1177_v44 }
 0x2d5   : > { %1679 = vst.msk [vmem:[%s2108_s16 + $0x38] sm:$0xff] %vm451_vm3, %v1190_v50  ;;  %1290 = vmatpush.msrb.mxu1 %v1190_v50  ;;  %1730 = vmatpush.msrb.mxu3 %v1190_v50 }
 0x2d7   : > { %1291 = vmatpush.msrb.mxu1 %v1189_v36  ;;  %1731 = vmatpush.msrb.mxu3 %v1189_v36 }
 0x2d8   : > { %v826_v56 = vpop.f32.mrf.mxu2 }
 0x2d9   : > { %1292 = vmatpush.msrb.mxu1 %v1188_v24  ;;  %1732 = vmatpush.msrb.mxu3 %v1188_v24  ;;  %v856_v60 = vmul.f32 %v826_v56, %v2225_v62 }
 0x2db   : > { %1293 = vmatpush.msrb.mxu1 %v1187_v2  ;;  %1733 = vmatpush.msrb.mxu3 %v1187_v2  ;;  %v890_v63 = vsel %vm451_vm3, %v856_v60, 0.0 }
 0x2dc   : > { %1684 = vmatmul.msk.f32.vlgmr.msrb.gmra.mxu1 %vm451_vm3, %v2338_v13  ;;  %1693 = vmatmul.msk.f32.vlgmr.msrb.gmra.mxu3 %vm451_vm3, %v2244_v6 }
 0x2dd   : > { %891 = vadd.xlane.f32.xlu2 %v890_v63 }
 0x2e0   : > { %v829_v0 = vpop.f32.mrf.mxu2 }
 0x2e1   : > { %v857_v62 = vmul.f32 %v829_v0, %v2236_v12  ;;  %v2424_v12 = vsub.f32 %v2202_v39, %v2241_v7 }
 0x2e3   : > { %v893_v9 = vsel %vm451_vm3, %v857_v62, 0.0 }
 0x2e4   : > { %1685 = vmatmul.msk.f32.gmra.mxu1 %vm451_vm3, %v2346_v14  ;;  %1694 = vmatmul.msk.f32.gmra.mxu3 %vm451_vm3, %v2318_v25 }
 0x2e5   : > { %894 = vadd.xlane.f32.xlu1 %v893_v9 }
 0x2e8   : > { %v832_v2 = vpop.f32.mrf.mxu2 }
 0x2e9   : > { %v858_v4 = vmul.f32 %v832_v2, %v2253_v46 }
 0x2eb   : > { %v896_v61 = vsel %vm451_vm3, %v858_v4, 0.0 }
 0x2ec   : > { %1686 = vmatmul.msk.f32.gmra.mxu1 %vm451_vm3, %v2354_v5  ;;  %1695 = vmatmul.msk.f32.gmra.mxu3 %vm451_vm3, %v2326_v40 }
 0x2ed   : > { %897 = vadd.xlane.f32.xlu2 %v896_v61 }
 0x2f0   : > { %v835_v39 = vpop.f32.mrf.mxu2 }
 0x2f1   : > { %v859_v16 = vmul.f32 %v835_v39, %v2264_v45 }
 0x2f3   : > { %v899_v22 = vsel %vm451_vm3, %v859_v16, 0.0 }
 0x2f4   : > { %1687 = vmatmul.msk.f32.gmra.mxu1 %vm451_vm3, %v2364_v1  ;;  %1696 = vmatmul.msk.f32.gmra.mxu3 %vm451_vm3, %v2334_v42 }
 0x2f5   : > { %900 = vadd.xlane.f32.xlu0 %v899_v22 }
 0x2f8   : > { %v838_v59 = vpop.f32.mrf.mxu2 }
 0x2f9   : > { %v860_v7 = vmul.f32 %v838_v59, %v2276_v21 }
 0x2fb   : > { %v902_v45 = vsel %vm451_vm3, %v860_v7, 0.0 }
 0x2fc   : > { %1688 = vmatmul.msk.f32.gmra.mxu1 %vm451_vm3, %v2374_v52  ;;  %1697 = vmatmul.msk.f32.gmra.mxu3 %vm451_vm3, %v2378_v3 }
 0x2fd   : > { %903 = vadd.xlane.f32.xlu1 %v902_v45 }
 0x300   : > { %v841_v27 = vpop.f32.mrf.mxu2 }
 0x301   : > { %v861_v29 = vmul.f32 %v841_v27, %v2288_v28 }
 0x303   : > { %v905_v30 = vsel %vm451_vm3, %v861_v29, 0.0 }
 0x304   : > { %1689 = vmatmul.msk.f32.gmra.mxu1 %vm451_vm3, %v2388_v54  ;;  %1698 = vmatmul.msk.f32.gmra.mxu3 %vm451_vm3, %v2392_v18 }
 0x305   : > { %906 = vadd.xlane.f32.xlu2 %v905_v30 }
 0x308   : > { %v844_v31 = vpop.f32.mrf.mxu2 }
 0x309   : > { %v862_v32 = vmul.f32 %v844_v31, %v2302_v38 }
 0x30b   : > { %v908_v33 = vsel %vm451_vm3, %v862_v32, 0.0 }
 0x30c   : > { %1690 = vmatmul.msk.f32.gmra.mxu1 %vm451_vm3, %v2402_v58  ;;  %1699 = vmatmul.msk.f32.gmra.mxu3 %vm451_vm3, %v2406_v26 }
 0x30d   : > { %909 = vadd.xlane.f32.xlu0 %v908_v33 }
 0x30f   : > { %v865_v37 = vpop.xlane.xlu2 %864 }
 0x310   : > { %911 = vst.msk [vmem:[%s2417_s17] sm:$0xff] %vm436_vm0, %v865_v37 }
 0x314   : > { %1691 = vmatmul.msk.f32.gmra.mxu1 %vm451_vm3, %v2424_v12 }
 0x315   : > { %v877_v8 = vpop.xlane.xlu1 %876 }
 0x316   : > { %915 = vst.msk [vmem:[%s2417_s17 + $0x20] sm:$0xff] %vm436_vm0, %v877_v8 }
 0x31c   : > { %1692 = vmatmul.msk.f32.gmra.mxu1 %vm451_vm3, %v2434_v15 }
 0x31d   : > { %v868_v46 = vpop.xlane.xlu1 %867  ;;  %v880_v17 = vpop.xlane.xlu2 %879 }
 0x31e   : > { %912 = vst.msk [vmem:[%s2417_s17 + $0x8] sm:$0xff] %vm436_vm0, %v868_v46 }
 0x31f   : > { %916 = vst.msk [vmem:[%s2417_s17 + $0x28] sm:$0xff] %vm436_vm0, %v880_v17  ;;  %v871_v23 = vpop.xlane.xlu0 %870 }
 0x320   : > { %913 = vst.msk [vmem:[%s2417_s17 + $0x10] sm:$0xff] %vm436_vm0, %v871_v23 }
 0x327   : > { %v874_v24 = vpop.xlane.xlu2 %873 }
 0x328   : > { %914 = vst.msk [vmem:[%s2417_s17 + $0x18] sm:$0xff] %vm436_vm0, %v874_v24 }
 0x332   : > { %v883_v11 = vpop.xlane.xlu1 %882 }
 0x333   : > { %917 = vst.msk [vmem:[%s2417_s17 + $0x30] sm:$0xff] %vm436_vm0, %v883_v11 }
 0x359   : > { %v1295_v21 = vpop.f32.mrf.mxu1 }
 0x35a   : > { %v1343_v34 = vmul.f32 %v1295_v21, %v2338_v13  ;;  %v886_v13 = vpop.xlane.xlu2 %885 }
 0x35b   : > { %918 = vst.msk [vmem:[%s2417_s17 + $0x38] sm:$0xff] %vm436_vm0, %v886_v13 }
 0x35c   : > { %v1359_v35 = vsel %vm451_vm3, %v1343_v34, 0.0 }
 0x35d   : > { %1360 = vadd.xlane.f32.xlu0 %v1359_v35 }
 0x35f   : > { %v1322_v36 = vpop.f32.mrf.mxu3 }
 0x360   : > { %v1352_v28 = vmul.f32 %v1322_v36, %v2244_v6 }
 0x361   : > { %v1298_v41 = vpop.f32.mrf.mxu1 }
 0x362   : > { %v1386_v43 = vsel %vm451_vm3, %v1352_v28, 0.0  ;;  %v1344_v44 = vmul.f32 %v1298_v41, %v2346_v14  ;;  %v889_v14 = vpop.xlane.xlu1 %888  ;;  %v892_v56 = vpop.xlane.xlu2 %891 }
 0x363   : > { %919 = vst.msk [vmem:[%s2417_s17 + $0x40] sm:$0xff] %vm436_vm0, %v889_v14 }
 0x364   : > { %v1362_v6 = vsel %vm451_vm3, %v1344_v44, 0.0  ;;  %920 = vst.msk [vmem:[%s2417_s17 + $0x48] sm:$0xff] %vm436_vm0, %v892_v56 }
 0x365   : > { %1387 = vadd.xlane.f32.xlu0 %v1386_v43 }
 0x367   : > { %v1325_v38 = vpop.f32.mrf.mxu3 }
 0x368   : > { %v1353_v19 = vmul.f32 %v1325_v38, %v2318_v25  ;;  %v901_v17 = vpop.xlane.xlu0 %900 }
 0x369   : > { %v1301_v50 = vpop.f32.mrf.mxu1  ;;  %923 = vst.msk [vmem:[%s2417_s17 + $0x60] sm:$0xff] %vm436_vm0, %v901_v17 }
 0x36a   : > { %v1389_v20 = vsel %vm451_vm3, %v1353_v19, 0.0  ;;  %v1345_v57 = vmul.f32 %v1301_v50, %v2354_v5  ;;  %v895_v37 = vpop.xlane.xlu1 %894 }
 0x36b   : > { %1390 = vadd.xlane.f32.xlu1 %v1389_v20  ;;  %921 = vst.msk [vmem:[%s2417_s17 + $0x50] sm:$0xff] %vm436_vm0, %v895_v37 }
 0x36c   : > { %v1365_v53 = vsel %vm451_vm3, %v1345_v57, 0.0 }
 0x36d   : > { %1363 = vadd.xlane.f32.xlu0 %v1362_v6 }
 0x36f   : > { %v1328_v47 = vpop.f32.mrf.mxu3 }
 0x370   : > { %v1354_v51 = vmul.f32 %v1328_v47, %v2326_v40 }
 0x371   : > { %v1304_v48 = vpop.f32.mrf.mxu1 }
 0x372   : > { %v1346_v25 = vmul.f32 %v1304_v48, %v2364_v1  ;;  %v1392_v10 = vsel %vm451_vm3, %v1354_v51, 0.0  ;;  %v904_v23 = vpop.xlane.xlu1 %903 }
 0x373   : > { %1393 = vadd.xlane.f32.xlu2 %v1392_v10  ;;  %924 = vst.msk [vmem:[%s2417_s17 + $0x68] sm:$0xff] %vm436_vm0, %v904_v23 }
 0x374   : > { %v1368_v49 = vsel %vm451_vm3, %v1346_v25, 0.0 }
 0x375   : > { %1366 = vadd.xlane.f32.xlu0 %v1365_v53  ;;  %1369 = vadd.xlane.f32.xlu1 %v1368_v49 }
 0x377   : > { %v1331_v55 = vpop.f32.mrf.mxu3 }
 0x378   : > { %v1355_v40 = vmul.f32 %v1331_v55, %v2334_v42 }
 0x379   : > { %v1307_v5 = vpop.f32.mrf.mxu1 }
 0x37a   : > { %v1347_v60 = vmul.f32 %v1307_v5, %v2374_v52  ;;  %v1395_v1 = vsel %vm451_vm3, %v1355_v40, 0.0 }
 0x37c   : > { %v1371_v63 = vsel %vm451_vm3, %v1347_v60, 0.0 }
 0x37d   : > { %1396 = vadd.xlane.f32.xlu0 %v1395_v1  ;;  %1372 = vadd.xlane.f32.xlu2 %v1371_v63 }
 0x37f   : > { %v1334_v0 = vpop.f32.mrf.mxu3 }
 0x380   : > { %v1356_v62 = vmul.f32 %v1334_v0, %v2378_v3  ;;  %v898_v3 = vpop.xlane.xlu2 %897 }
 0x381   : > { %v1310_v9 = vpop.f32.mrf.mxu1  ;;  %922 = vst.msk [vmem:[%s2417_s17 + $0x58] sm:$0xff] %vm436_vm0, %v898_v3 }
 0x382   : > { %v1348_v42 = vmul.f32 %v1310_v9, %v2388_v54  ;;  %v1398_v2 = vsel %vm451_vm3, %v1356_v62, 0.0 }
 0x383   : > { %1399 = vadd.xlane.f32.xlu1 %v1398_v2 }
 0x384   : > { %v1374_v52 = vsel %vm451_vm3, %v1348_v42, 0.0 }
 0x385   : > { %1375 = vadd.xlane.f32.xlu0 %v1374_v52 }
 0x387   : > { %v1337_v4 = vpop.f32.mrf.mxu3 }
 0x388   : > { %v1357_v8 = vmul.f32 %v1337_v4, %v2392_v18 }
 0x389   : > { %v1313_v61 = vpop.f32.mrf.mxu1 }
 0x38a   : > { %v1349_v39 = vmul.f32 %v1313_v61, %v2402_v58  ;;  %v1401_v54 = vsel %vm451_vm3, %v1357_v8, 0.0 }
 0x38b   : > { %1402 = vadd.xlane.f32.xlu2 %v1401_v54 }
 0x38c   : > { %v1377_v16 = vsel %vm451_vm3, %v1349_v39, 0.0 }
 0x38d   : > { %1378 = vadd.xlane.f32.xlu0 %v1377_v16 }
 0x391   : > { %v1316_v46 = vpop.f32.mrf.mxu1 }
 0x392   : > { %v1350_v22 = vmul.f32 %v1316_v46, %v2424_v12  ;;  %v1340_v12 = vpop.f32.mrf.mxu3 }
 0x394   : > { %v1380_v18 = vsel %vm451_vm3, %v1350_v22, 0.0 }
 0x395   : > { %1381 = vadd.xlane.f32.xlu0 %v1380_v18 }
 0x399   : > { %v1319_v58 = vpop.f32.mrf.mxu1 }
 0x39a   : > { %v1351_v59 = vmul.f32 %v1319_v58, %v2434_v15 }
 0x39b   : > { %1829 = shalt.err (!%p1826_p3)
}
 0x39c   : > { %s1868_s28 = smov 128   ;;  %s1869_s24 = smov 8   ;;  %v1383_v15 = vsel %vm451_vm3, %v1351_v59, 0.0  ;;  %v1358_v7 = vmul.f32 %v1340_v12, %v2406_v26  ;;  %v907_v45 = vpop.xlane.xlu2 %906  ;;  %v910_v27 = vpop.xlane.xlu0 %909 }
 0x39d   : > { %1746 = dma.vmem_to_hbm [thread:$0]  (%p1958_p5), %s1453_s27, 1024, %s1455_s26, %s1425_s25, %s1868_s28, %s1868_s28, %s1869_s24   ;;  %1384 = vadd.xlane.f32.xlu0 %v1383_v15 }
 0x39e   : > { %v1404_v24 = vsel %vm451_vm3, %v1358_v7, 0.0  ;;  %925 = vst.msk [vmem:[%s2417_s17 + $0x70] sm:$0xff] %vm436_vm0, %v907_v45 }
 0x39f   : > { %926 = vst.msk [vmem:[%s2417_s17 + $0x78] sm:$0xff] %vm436_vm0, %v910_v27 }
 0x3a5   : > { %1405 = vadd.xlane.f32.xlu0 %v1404_v24 }
 0x3d0   : > { %v1361_v29 = vpop.xlane.xlu0 %1360 }
 0x3d1   : > { %1700 = vst.msk [vmem:[%s2417_s17 + $0x80] sm:$0xff] %vm436_vm0, %v1361_v29 }
 0x3d8   : > { %v1388_v30 = vpop.xlane.xlu0 %1387 }
 0x3d9   : > { %1709 = vst.msk [vmem:[%s2417_s17 + $0xc8] sm:$0xff] %vm436_vm0, %v1388_v30 }
 0x3de   : > { %v1391_v26 = vpop.xlane.xlu1 %1390 }
 0x3df   : > { %1710 = vst.msk [vmem:[%s2417_s17 + $0xd0] sm:$0xff] %vm436_vm0, %v1391_v26 }
 0x3e0   : > { %v1364_v31 = vpop.xlane.xlu0 %1363 }
 0x3e1   : > { %1701 = vst.msk [vmem:[%s2417_s17 + $0x88] sm:$0xff] %vm436_vm0, %v1364_v31 }
 0x3e6   : > { %v1394_v32 = vpop.xlane.xlu2 %1393 }
 0x3e7   : > { %1711 = vst.msk [vmem:[%s2417_s17 + $0xd8] sm:$0xff] %vm436_vm0, %v1394_v32 }
 0x3e8   : > { %v1367_v33 = vpop.xlane.xlu0 %1366  ;;  %v1370_v21 = vpop.xlane.xlu1 %1369 }
 0x3e9   : > { %1702 = vst.msk [vmem:[%s2417_s17 + $0x90] sm:$0xff] %vm436_vm0, %v1367_v33 }
 0x3ea   : > { %1703 = vst.msk [vmem:[%s2417_s17 + $0x98] sm:$0xff] %vm436_vm0, %v1370_v21 }
 0x3f0   : > { %v1397_v34 = vpop.xlane.xlu0 %1396  ;;  %v1373_v35 = vpop.xlane.xlu2 %1372 }
 0x3f1   : > { %1712 = vst.msk [vmem:[%s2417_s17 + $0xe0] sm:$0xff] %vm436_vm0, %v1397_v34 }
 0x3f2   : > { %1704 = vst.msk [vmem:[%s2417_s17 + $0xa0] sm:$0xff] %vm436_vm0, %v1373_v35 }
 0x3f6   : > { %v1400_v36 = vpop.xlane.xlu1 %1399 }
 0x3f7   : > { %1713 = vst.msk [vmem:[%s2417_s17 + $0xe8] sm:$0xff] %vm436_vm0, %v1400_v36 }
 0x3f8   : > { %v1376_v28 = vpop.xlane.xlu0 %1375 }
 0x3f9   : > { %1705 = vst.msk [vmem:[%s2417_s17 + $0xa8] sm:$0xff] %vm436_vm0, %v1376_v28 }
 0x3fe   : > { %v1403_v41 = vpop.xlane.xlu2 %1402 }
 0x3ff   : > { %1714 = vst.msk [vmem:[%s2417_s17 + $0xf0] sm:$0xff] %vm436_vm0, %v1403_v41 }
 0x400   : > { %v1379_v11 = vpop.xlane.xlu0 %1378 }
 0x401   : > { %1706 = vst.msk [vmem:[%s2417_s17 + $0xb0] sm:$0xff] %vm436_vm0, %v1379_v11 }
 0x408   : > { %v1382_v43 = vpop.xlane.xlu0 %1381 }
 0x409   : > { %1707 = vst.msk [vmem:[%s2417_s17 + $0xb8] sm:$0xff] %vm436_vm0, %v1382_v43 }
 0x410   : > { %v1385_v38 = vpop.xlane.xlu0 %1384 }
 0x411   : > { %1708 = vst.msk [vmem:[%s2417_s17 + $0xc0] sm:$0xff] %vm436_vm0, %v1385_v38 }
 0x418   : > { %v1406_v44 = vpop.xlane.xlu0 %1405 }
 0x419   : > { %1715 = vst.msk [vmem:[%s2417_s17 + $0xf8] sm:$0xff] %vm436_vm0, %v1406_v44 }
 0x41a PF: > { %p1752_p4 = scmp.ge.s32.totalorder %s1864_s12, 2  ;;  %s1481_s19 = sand.u32 1, %s1852_s30  }
 0x41b   : > { %s1482_s27 = scalar_lea.sflag [#allocation3], %s1481_s19 }
 0x41c   : > { %p1749_p5 = pnand %p1752_p4, %p1962_p6 }
 0x41e   : > { %p1750_p7 = pneg %p1749_p5 }
 0x420   : > { %1847 = dma.done.wait (%p1750_p7), %s1482_s27, 1024  }
 0x421   : > { %1849 = vsyncadd (%p1750_p7), %s1482_s27, 4294966272  ;;  %p20_p8 = scmp.ge.s32.totalorder %s1945_s15, 7   ;;  %s2584_s30 = smov %s1856_s10 }
 0x422   : > { %s2585_s10 = smov %s1860_s11  ;;  %s2586_s11 = smov %s1956_s18 }
 0x423   : > { %s2587_s12 = smov %s1945_s15  ;;  %22 = sbr.rel (!%p20_p8) target bundleno = 3 (0x3), region = 130 }
 0x428   :  { %1511 = vsyncpa [#allocation3], 1 }
 0x429   :  { %1513 = vsyncpa [#allocation3 + $0x1], 1 }

</bundles_post_ra>
